<compile_context>
chip_gen: v7x
topology: tpu7x:2x2x1
jax: 0.10.0
libtpu: 0.0.40
codegen_flags: <defaults>
</compile_context>

<pallas_src>
import functools

import jax
import jax.numpy as jnp
from jax import lax
from jax.experimental import pallas as pl
from jax.experimental.pallas import tpu as pltpu


def _heads_per_group(num_heads, head_dim, target=256):
    """Smallest divisor g of num_heads with g*head_dim >= min(target, C).

    target=256 gives full MXU width on v6e/v7x (and 2 full passes on v5e's 128-wide MXU).
    """
    target = min(target, num_heads * head_dim)
    for cand in range(1, num_heads + 1):
        if num_heads % cand == 0 and cand * head_dim >= target:
            return cand
    return num_heads


def _attn_kernel(x_ref, wq_ref, wk_ref, wv_ref, bqkv_ref, wp_ref, bp_ref,
                 out_ref, ctx_ref, *, n_valid, heads_per_group, head_dim,
                 num_groups):
    """One (batch, head-group) grid step."""
    g_idx = pl.program_id(1)
    gd = heads_per_group * head_dim

    x = x_ref[0]                                                   # (n_pad, C) bf16
    n_pad = x.shape[0]

    # --- group-wide Q/K/V projections: wide MXU matmuls (width = g*hd), f32 accumulate.
    # Weights are grid-resident; dynamic first-axis index picks this group's slab.
    b_g = bqkv_ref[g_idx]                                          # (3, 1, gd) f32
    q = jnp.dot(x, wq_ref[g_idx], preferred_element_type=jnp.float32) + b_g[0]   # scale folded
    k = jnp.dot(x, wk_ref[g_idx], preferred_element_type=jnp.float32) + b_g[1]
    v = jnp.dot(x, wv_ref[g_idx], preferred_element_type=jnp.float32) + b_g[2]

    key_mask = None
    if n_valid < n_pad:  # static: mask padded key columns before softmax (f32, safe)
        col = lax.broadcasted_iota(jnp.int32, (n_pad, n_pad), 1)
        key_mask = col < n_valid

    # --- per-head attention: short unrolled loop over the g heads of this group. ---
    ctx_parts = []
    for h in range(heads_per_group):
        sl = slice(h * head_dim, (h + 1) * head_dim)
        qh = q[:, sl].astype(jnp.bfloat16)
        kh = k[:, sl].astype(jnp.bfloat16)
        vh = v[:, sl].astype(jnp.bfloat16)

        # logits = q @ k^T without an explicit transpose: contract the hd axes on the MXU.
        logits = lax.dot_general(
            qh, kh, dimension_numbers=(((1,), (1,)), ((), ())),
            preferred_element_type=jnp.float32)                    # (n_pad, n_pad) f32
        if key_mask is not None:
            logits = jnp.where(key_mask, logits, jnp.float32(-1e30))

        # Softmax in f32 (VPU/EUP); normalize after attn@v so the divide is O(N*hd).
        logits = logits - jnp.max(logits, axis=-1, keepdims=True)
        p = jnp.exp(logits)
        denom = jnp.sum(p, axis=-1, keepdims=True)                 # (n_pad, 1) f32

        ctx_h = jnp.dot(p.astype(jnp.bfloat16), vh,
                        preferred_element_type=jnp.float32)        # (n_pad, hd) f32
        ctx_parts.append((ctx_h * pl.reciprocal(denom, approx=True)).astype(jnp.bfloat16))

    ctx_g = ctx_parts[0] if len(ctx_parts) == 1 else jnp.concatenate(ctx_parts, axis=-1)

    # --- lane-dense store of this group's context columns into the (n_pad, C) scratch.
    # Group offsets are multiples of g*hd (128-aligned for real ViT shapes -> unmasked vst).
    if num_groups == 1:
        ctx_ref[...] = ctx_g
    else:
        off = g_idx * gd
        if gd % 128 == 0:
            off = pl.multiple_of(off, 128)
        ctx_ref[:, pl.ds(off, gd)] = ctx_g

    # --- deferred output projection: ONE full-depth (n_pad, C) @ (C, C) matmul + bias. ---
    @pl.when(g_idx == num_groups - 1)
    def _():
        out_ref[0] = (jnp.dot(ctx_ref[...], wp_ref[...],
                              preferred_element_type=jnp.float32)
                      + bp_ref[...]).astype(out_ref.dtype)


def attention_forward(x, w_qkv, b_qkv, w_proj, b_proj, *, num_heads):
    """Multi-head self-attention.

    x:      (B, N, C) f32
    w_qkv:  (C, 3C)   f32   (nn.Linear weight transposed; columns ordered [q | k | v])
    b_qkv:  (3C,)     f32
    w_proj: (C, C)    f32   (nn.Linear weight transposed)
    b_proj: (C,)      f32
    """
    B, N, C = x.shape
    assert C % num_heads == 0, "C must be divisible by num_heads"
    hd = C // num_heads
    scale = hd ** (-0.5)

    g = _heads_per_group(num_heads, hd)      # heads per grid step
    G = num_heads // g                       # head groups
    gd = g * hd                              # group width (256 for ViT-B)

    # Token axis is second-minor (sublanes): pad to a multiple of 8 only (not 128).
    n_pad = ((N + 7) // 8) * 8

    # ---- host-side one-time weight prep: per-group layout, scale folded into Wq/bq, bf16 ----
    w3 = w_qkv.reshape(C, 3, num_heads, hd)                               # (C, 3, H, hd)

    def group_pack(w):                                                    # (C, H, hd) -> (G, C, gd)
        return w.reshape(C, G, gd).transpose(1, 0, 2)

    wq = (group_pack(w3[:, 0]) * scale).astype(jnp.bfloat16)              # (G, C, gd)
    wk = group_pack(w3[:, 1]).astype(jnp.bfloat16)
    wv = group_pack(w3[:, 2]).astype(jnp.bfloat16)

    b3 = b_qkv.reshape(3, num_heads, hd).astype(jnp.float32)              # (3, H, hd)
    bq = b3[0].reshape(G, gd) * scale
    bk = b3[1].reshape(G, gd)
    bv = b3[2].reshape(G, gd)
    bqkv = jnp.stack([bq, bk, bv], axis=1).reshape(G, 3, 1, gd)           # (G, 3, 1, gd) f32

    wp = w_proj.astype(jnp.bfloat16)                                      # (C, C)
    bp = b_proj.reshape(1, C).astype(jnp.float32)                         # (1, C)

    x_p = x.astype(jnp.bfloat16)
    if n_pad != N:
        x_p = jnp.pad(x_p, ((0, 0), (0, n_pad - N), (0, 0)))

    kernel = functools.partial(_attn_kernel, n_valid=N, heads_per_group=g,
                               head_dim=hd, num_groups=G)

    out = pl.pallas_call(
        kernel,
        out_shape=jax.ShapeDtypeStruct((B, n_pad, C), jnp.float32),
        grid_spec=pltpu.PrefetchScalarGridSpec(
            num_scalar_prefetch=0,
            grid=(B, G),                                      # head-group axis is a reduction
            in_specs=[
                pl.BlockSpec((1, n_pad, C), lambda b, gi: (b, 0, 0)),     # x (resident over groups)
                pl.BlockSpec((G, C, gd), lambda b, gi: (0, 0, 0)),        # Wq  — grid-resident
                pl.BlockSpec((G, C, gd), lambda b, gi: (0, 0, 0)),        # Wk  — grid-resident
                pl.BlockSpec((G, C, gd), lambda b, gi: (0, 0, 0)),        # Wv  — grid-resident
                pl.BlockSpec((G, 3, 1, gd), lambda b, gi: (0, 0, 0, 0)),  # fused q/k/v biases
                pl.BlockSpec((C, C), lambda b, gi: (0, 0)),               # Wproj — grid-resident
                pl.BlockSpec((1, C), lambda b, gi: (0, 0)),               # bproj
            ],
            out_specs=pl.BlockSpec((1, n_pad, C), lambda b, gi: (b, 0, 0)),
            scratch_shapes=[pltpu.VMEM((n_pad, C), jnp.bfloat16)],        # head-concat context
        ),
        compiler_params=pltpu.CompilerParams(
            # batch axis shards across TensorCores (megacore/v7x); group axis accumulates.
            dimension_semantics=("parallel", "arbitrary"),
            vmem_limit_bytes=32 * 1024 * 1024,
        ),
    )(x_p, wq, wk, wv, bqkv, wp, bp)

    return out[:, :N, :]


def attention_reference(x, w_qkv, b_qkv, w_proj, b_proj, *, num_heads):
    """Pure-JAX (f32) reference mirroring the PyTorch forward."""
    B, N, C = x.shape
    hd = C // num_heads
    scale = hd ** (-0.5)
    qkv = x @ w_qkv + b_qkv                                       # (B, N, 3C)
    qkv = qkv.reshape(B, N, 3, num_heads, hd).transpose(2, 0, 3, 1, 4)
    q, k, v = qkv[0], qkv[1], qkv[2]                              # (B, H, N, hd)
    attn = jnp.einsum("bhnd,bhmd->bhnm", q, k) * scale
    attn = jax.nn.softmax(attn, axis=-1)
    out = jnp.einsum("bhnm,bhmd->bhnd", attn, v)                  # (B, H, N, hd)
    out = out.transpose(0, 2, 1, 3).reshape(B, N, C)
    return out @ w_proj + b_proj


if __name__ == "__main__":
    B, N, C = 2, 8, 32
    NUM_HEADS = 8

    key = jax.random.PRNGKey(0)
    kx, kq, kqb, kp, kb = jax.random.split(key, 5)

    x = jax.random.normal(kx, (B, N, C), dtype=jnp.float32)
    # nn.Linear-shaped synthetic parameters, stored transposed (in_features, out_features).
    w_qkv = jax.random.normal(kq, (C, 3 * C), dtype=jnp.float32) * 0.05
    b_qkv = jax.random.normal(kqb, (3 * C,), dtype=jnp.float32) * 0.01   # qkv_bias=True (ViT default)
    w_proj = jax.random.normal(kp, (C, C), dtype=jnp.float32) * 0.05
    b_proj = jax.random.normal(kb, (C,), dtype=jnp.float32) * 0.01

    out = attention_forward(x, w_qkv, b_qkv, w_proj, b_proj, num_heads=NUM_HEADS)
    out = jax.block_until_ready(out)

    ref = attention_reference(x, w_qkv, b_qkv, w_proj, b_proj, num_heads=NUM_HEADS)
    assert out.shape == (B, N, C)
    max_err = float(jnp.max(jnp.abs(out - ref)))
    # bf16 matmul operands + approx reciprocal -> loosen tolerance vs the f32 reference.
    assert jnp.allclose(out, ref, atol=2e-2, rtol=2e-2), f"mismatch vs reference (max abs err {max_err})"

    print("KERNEL_OK")
</pallas_src>

<mosaic_0001>
module attributes {stable_mosaic.version = 11 : i64} {
  func.func @_attn_kernel(%arg0: i32, %arg1: i32, %arg2: memref<1x8x32xbf16, #tpu.memory_space<vmem>>, %arg3: memref<1x32x32xbf16, #tpu.memory_space<vmem>>, %arg4: memref<1x32x32xbf16, #tpu.memory_space<vmem>>, %arg5: memref<1x32x32xbf16, #tpu.memory_space<vmem>>, %arg6: memref<1x3x1x32xf32, #tpu.memory_space<vmem>>, %arg7: memref<32x32xbf16, #tpu.memory_space<vmem>>, %arg8: memref<1x32xf32, #tpu.memory_space<vmem>>, %arg9: memref<1x8x32xf32, #tpu.memory_space<vmem>>, %arg10: memref<8x32xbf16, #tpu.memory_space<vmem>>) attributes {dimension_semantics = [#tpu.dimension_semantics<parallel>, #tpu.dimension_semantics<arbitrary>], iteration_bounds = array<i64: 2, 1>, scalar_prefetch = 0 : i64, scratch_operands = 1 : i64, tpu.core_type = #tpu.core_type<tc>, window_params = [{transform_indices = @transform_0, window_bounds = array<i64: 1, 8, 32>}, {pipeline_mode = #tpu.pipeline_mode<synchronous>, transform_indices = @transform_1, window_bounds = array<i64: 1, 32, 32>}, {pipeline_mode = #tpu.pipeline_mode<synchronous>, transform_indices = @transform_2, window_bounds = array<i64: 1, 32, 32>}, {pipeline_mode = #tpu.pipeline_mode<synchronous>, transform_indices = @transform_3, window_bounds = array<i64: 1, 32, 32>}, {pipeline_mode = #tpu.pipeline_mode<synchronous>, transform_indices = @transform_4, window_bounds = array<i64: 1, 3, 1, 32>}, {pipeline_mode = #tpu.pipeline_mode<synchronous>, transform_indices = @transform_5, window_bounds = array<i64: 32, 32>}, {pipeline_mode = #tpu.pipeline_mode<synchronous>, transform_indices = @transform_6, window_bounds = array<i64: 1, 32>}, {transform_indices = @transform_7, window_bounds = array<i64: 1, 8, 32>}]} {
    %c0 = arith.constant 0 : index
    %c0_0 = arith.constant 0 : index
    %c0_1 = arith.constant 0 : index
    %0 = vector.load %arg2[%c0, %c0_0, %c0_1] : memref<1x8x32xbf16, #tpu.memory_space<vmem>>, vector<1x8x32xbf16>
    %1 = vector.shape_cast %0 : vector<1x8x32xbf16> to vector<8x32xbf16>
    %2 = arith.index_cast %arg1 : i32 to index
    %c0_2 = arith.constant 0 : index
    %c0_3 = arith.constant 0 : index
    %c0_4 = arith.constant 0 : index
    %3 = vector.load %arg6[%2, %c0_2, %c0_3, %c0_4] : memref<1x3x1x32xf32, #tpu.memory_space<vmem>>, vector<1x3x1x32xf32>
    %4 = vector.shape_cast %3 : vector<1x3x1x32xf32> to vector<3x1x32xf32>
    %5 = arith.index_cast %arg1 : i32 to index
    %c0_5 = arith.constant 0 : index
    %c0_6 = arith.constant 0 : index
    %6 = vector.load %arg3[%5, %c0_5, %c0_6] : memref<1x32x32xbf16, #tpu.memory_space<vmem>>, vector<1x32x32xbf16>
    %7 = vector.shape_cast %6 : vector<1x32x32xbf16> to vector<32x32xbf16>
    %cst = arith.constant dense<0.000000e+00> : vector<8x32xf32>
    %8 = tpu.matmul %1, %7, %cst {dimension_numbers = #tpu.dot_dimension_numbers<[1], [0], [0], [1], [0, 0, 1, 1], [], []>} : vector<8x32xbf16>, vector<32x32xbf16>, vector<8x32xf32> -> vector<8x32xf32>
    %9 = vector.extract_strided_slice %4 {offsets = [0, 0, 0], sizes = [1, 1, 32], strides = [1, 1, 1]} : vector<3x1x32xf32> to vector<1x1x32xf32>
    %10 = vector.shape_cast %9 : vector<1x1x32xf32> to vector<1x32xf32>
    %11 = vector.broadcast %10 : vector<1x32xf32> to vector<8x32xf32>
    %12 = arith.addf %8, %11 : vector<8x32xf32>
    %13 = arith.index_cast %arg1 : i32 to index
    %c0_7 = arith.constant 0 : index
    %c0_8 = arith.constant 0 : index
    %14 = vector.load %arg4[%13, %c0_7, %c0_8] : memref<1x32x32xbf16, #tpu.memory_space<vmem>>, vector<1x32x32xbf16>
    %15 = vector.shape_cast %14 : vector<1x32x32xbf16> to vector<32x32xbf16>
    %cst_9 = arith.constant dense<0.000000e+00> : vector<8x32xf32>
    %16 = tpu.matmul %1, %15, %cst_9 {dimension_numbers = #tpu.dot_dimension_numbers<[1], [0], [0], [1], [0, 0, 1, 1], [], []>} : vector<8x32xbf16>, vector<32x32xbf16>, vector<8x32xf32> -> vector<8x32xf32>
    %17 = vector.extract_strided_slice %4 {offsets = [1, 0, 0], sizes = [1, 1, 32], strides = [1, 1, 1]} : vector<3x1x32xf32> to vector<1x1x32xf32>
    %18 = vector.shape_cast %17 : vector<1x1x32xf32> to vector<1x32xf32>
    %19 = vector.broadcast %18 : vector<1x32xf32> to vector<8x32xf32>
    %20 = arith.addf %16, %19 : vector<8x32xf32>
    %21 = arith.index_cast %arg1 : i32 to index
    %c0_10 = arith.constant 0 : index
    %c0_11 = arith.constant 0 : index
    %22 = vector.load %arg5[%21, %c0_10, %c0_11] : memref<1x32x32xbf16, #tpu.memory_space<vmem>>, vector<1x32x32xbf16>
    %23 = vector.shape_cast %22 : vector<1x32x32xbf16> to vector<32x32xbf16>
    %cst_12 = arith.constant dense<0.000000e+00> : vector<8x32xf32>
    %24 = tpu.matmul %1, %23, %cst_12 {dimension_numbers = #tpu.dot_dimension_numbers<[1], [0], [0], [1], [0, 0, 1, 1], [], []>} : vector<8x32xbf16>, vector<32x32xbf16>, vector<8x32xf32> -> vector<8x32xf32>
    %25 = vector.extract_strided_slice %4 {offsets = [2, 0, 0], sizes = [1, 1, 32], strides = [1, 1, 1]} : vector<3x1x32xf32> to vector<1x1x32xf32>
    %26 = vector.shape_cast %25 : vector<1x1x32xf32> to vector<1x32xf32>
    %27 = vector.broadcast %26 : vector<1x32xf32> to vector<8x32xf32>
    %28 = arith.addf %24, %27 : vector<8x32xf32>
    %29 = vector.extract_strided_slice %12 {offsets = [0, 0], sizes = [8, 4], strides = [1, 1]} : vector<8x32xf32> to vector<8x4xf32>
    %30 = arith.truncf %29 : vector<8x4xf32> to vector<8x4xbf16>
    %31 = vector.extract_strided_slice %20 {offsets = [0, 0], sizes = [8, 4], strides = [1, 1]} : vector<8x32xf32> to vector<8x4xf32>
    %32 = arith.truncf %31 : vector<8x4xf32> to vector<8x4xbf16>
    %33 = vector.extract_strided_slice %28 {offsets = [0, 0], sizes = [8, 4], strides = [1, 1]} : vector<8x32xf32> to vector<8x4xf32>
    %34 = arith.truncf %33 : vector<8x4xf32> to vector<8x4xbf16>
    %cst_13 = arith.constant dense<0.000000e+00> : vector<8x8xf32>
    %35 = tpu.matmul %30, %32, %cst_13 {dimension_numbers = #tpu.dot_dimension_numbers<[1], [1], [0], [0], [0, 0, 1, 0], [], []>} : vector<8x4xbf16>, vector<8x4xbf16>, vector<8x8xf32> -> vector<8x8xf32>
    %cst_14 = arith.constant dense<0xFF800000> : vector<8xf32>
    %36 = vector.multi_reduction <maximumf>, %35, %cst_14 [1] : vector<8x8xf32> to vector<8xf32>
    %37 = vector.shape_cast %36 : vector<8xf32> to vector<8x1xf32>
    %38 = vector.broadcast %37 : vector<8x1xf32> to vector<8x8xf32>
    %39 = arith.subf %35, %38 : vector<8x8xf32>
    %40 = math.exp %39 : vector<8x8xf32>
    %cst_15 = arith.constant dense<0.000000e+00> : vector<8xf32>
    %41 = vector.multi_reduction <add>, %40, %cst_15 [1] : vector<8x8xf32> to vector<8xf32>
    %42 = vector.shape_cast %41 : vector<8xf32> to vector<8x1xf32>
    %43 = arith.truncf %40 : vector<8x8xf32> to vector<8x8xbf16>
    %cst_16 = arith.constant dense<0.000000e+00> : vector<8x4xf32>
    %44 = tpu.matmul %43, %34, %cst_16 {dimension_numbers = #tpu.dot_dimension_numbers<[1], [0], [0], [1], [0, 0, 1, 1], [], []>} : vector<8x8xbf16>, vector<8x4xbf16>, vector<8x4xf32> -> vector<8x4xf32>
    %45 = tpu.reciprocal %42 {approx = true} : vector<8x1xf32> -> vector<8x1xf32>
    %46 = vector.broadcast %45 : vector<8x1xf32> to vector<8x4xf32>
    %47 = arith.mulf %44, %46 : vector<8x4xf32>
    %48 = arith.truncf %47 : vector<8x4xf32> to vector<8x4xbf16>
    %49 = vector.extract_strided_slice %12 {offsets = [0, 4], sizes = [8, 4], strides = [1, 1]} : vector<8x32xf32> to vector<8x4xf32>
    %50 = arith.truncf %49 : vector<8x4xf32> to vector<8x4xbf16>
    %51 = vector.extract_strided_slice %20 {offsets = [0, 4], sizes = [8, 4], strides = [1, 1]} : vector<8x32xf32> to vector<8x4xf32>
    %52 = arith.truncf %51 : vector<8x4xf32> to vector<8x4xbf16>
    %53 = vector.extract_strided_slice %28 {offsets = [0, 4], sizes = [8, 4], strides = [1, 1]} : vector<8x32xf32> to vector<8x4xf32>
    %54 = arith.truncf %53 : vector<8x4xf32> to vector<8x4xbf16>
    %cst_17 = arith.constant dense<0.000000e+00> : vector<8x8xf32>
    %55 = tpu.matmul %50, %52, %cst_17 {dimension_numbers = #tpu.dot_dimension_numbers<[1], [1], [0], [0], [0, 0, 1, 0], [], []>} : vector<8x4xbf16>, vector<8x4xbf16>, vector<8x8xf32> -> vector<8x8xf32>
    %cst_18 = arith.constant dense<0xFF800000> : vector<8xf32>
    %56 = vector.multi_reduction <maximumf>, %55, %cst_18 [1] : vector<8x8xf32> to vector<8xf32>
    %57 = vector.shape_cast %56 : vector<8xf32> to vector<8x1xf32>
    %58 = vector.broadcast %57 : vector<8x1xf32> to vector<8x8xf32>
    %59 = arith.subf %55, %58 : vector<8x8xf32>
    %60 = math.exp %59 : vector<8x8xf32>
    %cst_19 = arith.constant dense<0.000000e+00> : vector<8xf32>
    %61 = vector.multi_reduction <add>, %60, %cst_19 [1] : vector<8x8xf32> to vector<8xf32>
    %62 = vector.shape_cast %61 : vector<8xf32> to vector<8x1xf32>
    %63 = arith.truncf %60 : vector<8x8xf32> to vector<8x8xbf16>
    %cst_20 = arith.constant dense<0.000000e+00> : vector<8x4xf32>
    %64 = tpu.matmul %63, %54, %cst_20 {dimension_numbers = #tpu.dot_dimension_numbers<[1], [0], [0], [1], [0, 0, 1, 1], [], []>} : vector<8x8xbf16>, vector<8x4xbf16>, vector<8x4xf32> -> vector<8x4xf32>
    %65 = tpu.reciprocal %62 {approx = true} : vector<8x1xf32> -> vector<8x1xf32>
    %66 = vector.broadcast %65 : vector<8x1xf32> to vector<8x4xf32>
    %67 = arith.mulf %64, %66 : vector<8x4xf32>
    %68 = arith.truncf %67 : vector<8x4xf32> to vector<8x4xbf16>
    %69 = vector.extract_strided_slice %12 {offsets = [0, 8], sizes = [8, 4], strides = [1, 1]} : vector<8x32xf32> to vector<8x4xf32>
    %70 = arith.truncf %69 : vector<8x4xf32> to vector<8x4xbf16>
    %71 = vector.extract_strided_slice %20 {offsets = [0, 8], sizes = [8, 4], strides = [1, 1]} : vector<8x32xf32> to vector<8x4xf32>
    %72 = arith.truncf %71 : vector<8x4xf32> to vector<8x4xbf16>
    %73 = vector.extract_strided_slice %28 {offsets = [0, 8], sizes = [8, 4], strides = [1, 1]} : vector<8x32xf32> to vector<8x4xf32>
    %74 = arith.truncf %73 : vector<8x4xf32> to vector<8x4xbf16>
    %cst_21 = arith.constant dense<0.000000e+00> : vector<8x8xf32>
    %75 = tpu.matmul %70, %72, %cst_21 {dimension_numbers = #tpu.dot_dimension_numbers<[1], [1], [0], [0], [0, 0, 1, 0], [], []>} : vector<8x4xbf16>, vector<8x4xbf16>, vector<8x8xf32> -> vector<8x8xf32>
    %cst_22 = arith.constant dense<0xFF800000> : vector<8xf32>
    %76 = vector.multi_reduction <maximumf>, %75, %cst_22 [1] : vector<8x8xf32> to vector<8xf32>
    %77 = vector.shape_cast %76 : vector<8xf32> to vector<8x1xf32>
    %78 = vector.broadcast %77 : vector<8x1xf32> to vector<8x8xf32>
    %79 = arith.subf %75, %78 : vector<8x8xf32>
    %80 = math.exp %79 : vector<8x8xf32>
    %cst_23 = arith.constant dense<0.000000e+00> : vector<8xf32>
    %81 = vector.multi_reduction <add>, %80, %cst_23 [1] : vector<8x8xf32> to vector<8xf32>
    %82 = vector.shape_cast %81 : vector<8xf32> to vector<8x1xf32>
    %83 = arith.truncf %80 : vector<8x8xf32> to vector<8x8xbf16>
    %cst_24 = arith.constant dense<0.000000e+00> : vector<8x4xf32>
    %84 = tpu.matmul %83, %74, %cst_24 {dimension_numbers = #tpu.dot_dimension_numbers<[1], [0], [0], [1], [0, 0, 1, 1], [], []>} : vector<8x8xbf16>, vector<8x4xbf16>, vector<8x4xf32> -> vector<8x4xf32>
    %85 = tpu.reciprocal %82 {approx = true} : vector<8x1xf32> -> vector<8x1xf32>
    %86 = vector.broadcast %85 : vector<8x1xf32> to vector<8x4xf32>
    %87 = arith.mulf %84, %86 : vector<8x4xf32>
    %88 = arith.truncf %87 : vector<8x4xf32> to vector<8x4xbf16>
    %89 = vector.extract_strided_slice %12 {offsets = [0, 12], sizes = [8, 4], strides = [1, 1]} : vector<8x32xf32> to vector<8x4xf32>
    %90 = arith.truncf %89 : vector<8x4xf32> to vector<8x4xbf16>
    %91 = vector.extract_strided_slice %20 {offsets = [0, 12], sizes = [8, 4], strides = [1, 1]} : vector<8x32xf32> to vector<8x4xf32>
    %92 = arith.truncf %91 : vector<8x4xf32> to vector<8x4xbf16>
    %93 = vector.extract_strided_slice %28 {offsets = [0, 12], sizes = [8, 4], strides = [1, 1]} : vector<8x32xf32> to vector<8x4xf32>
    %94 = arith.truncf %93 : vector<8x4xf32> to vector<8x4xbf16>
    %cst_25 = arith.constant dense<0.000000e+00> : vector<8x8xf32>
    %95 = tpu.matmul %90, %92, %cst_25 {dimension_numbers = #tpu.dot_dimension_numbers<[1], [1], [0], [0], [0, 0, 1, 0], [], []>} : vector<8x4xbf16>, vector<8x4xbf16>, vector<8x8xf32> -> vector<8x8xf32>
    %cst_26 = arith.constant dense<0xFF800000> : vector<8xf32>
    %96 = vector.multi_reduction <maximumf>, %95, %cst_26 [1] : vector<8x8xf32> to vector<8xf32>
    %97 = vector.shape_cast %96 : vector<8xf32> to vector<8x1xf32>
    %98 = vector.broadcast %97 : vector<8x1xf32> to vector<8x8xf32>
    %99 = arith.subf %95, %98 : vector<8x8xf32>
    %100 = math.exp %99 : vector<8x8xf32>
    %cst_27 = arith.constant dense<0.000000e+00> : vector<8xf32>
    %101 = vector.multi_reduction <add>, %100, %cst_27 [1] : vector<8x8xf32> to vector<8xf32>
    %102 = vector.shape_cast %101 : vector<8xf32> to vector<8x1xf32>
    %103 = arith.truncf %100 : vector<8x8xf32> to vector<8x8xbf16>
    %cst_28 = arith.constant dense<0.000000e+00> : vector<8x4xf32>
    %104 = tpu.matmul %103, %94, %cst_28 {dimension_numbers = #tpu.dot_dimension_numbers<[1], [0], [0], [1], [0, 0, 1, 1], [], []>} : vector<8x8xbf16>, vector<8x4xbf16>, vector<8x4xf32> -> vector<8x4xf32>
    %105 = tpu.reciprocal %102 {approx = true} : vector<8x1xf32> -> vector<8x1xf32>
    %106 = vector.broadcast %105 : vector<8x1xf32> to vector<8x4xf32>
    %107 = arith.mulf %104, %106 : vector<8x4xf32>
    %108 = arith.truncf %107 : vector<8x4xf32> to vector<8x4xbf16>
    %109 = vector.extract_strided_slice %12 {offsets = [0, 16], sizes = [8, 4], strides = [1, 1]} : vector<8x32xf32> to vector<8x4xf32>
    %110 = arith.truncf %109 : vector<8x4xf32> to vector<8x4xbf16>
    %111 = vector.extract_strided_slice %20 {offsets = [0, 16], sizes = [8, 4], strides = [1, 1]} : vector<8x32xf32> to vector<8x4xf32>
    %112 = arith.truncf %111 : vector<8x4xf32> to vector<8x4xbf16>
    %113 = vector.extract_strided_slice %28 {offsets = [0, 16], sizes = [8, 4], strides = [1, 1]} : vector<8x32xf32> to vector<8x4xf32>
    %114 = arith.truncf %113 : vector<8x4xf32> to vector<8x4xbf16>
    %cst_29 = arith.constant dense<0.000000e+00> : vector<8x8xf32>
    %115 = tpu.matmul %110, %112, %cst_29 {dimension_numbers = #tpu.dot_dimension_numbers<[1], [1], [0], [0], [0, 0, 1, 0], [], []>} : vector<8x4xbf16>, vector<8x4xbf16>, vector<8x8xf32> -> vector<8x8xf32>
    %cst_30 = arith.constant dense<0xFF800000> : vector<8xf32>
    %116 = vector.multi_reduction <maximumf>, %115, %cst_30 [1] : vector<8x8xf32> to vector<8xf32>
    %117 = vector.shape_cast %116 : vector<8xf32> to vector<8x1xf32>
    %118 = vector.broadcast %117 : vector<8x1xf32> to vector<8x8xf32>
    %119 = arith.subf %115, %118 : vector<8x8xf32>
    %120 = math.exp %119 : vector<8x8xf32>
    %cst_31 = arith.constant dense<0.000000e+00> : vector<8xf32>
    %121 = vector.multi_reduction <add>, %120, %cst_31 [1] : vector<8x8xf32> to vector<8xf32>
    %122 = vector.shape_cast %121 : vector<8xf32> to vector<8x1xf32>
    %123 = arith.truncf %120 : vector<8x8xf32> to vector<8x8xbf16>
    %cst_32 = arith.constant dense<0.000000e+00> : vector<8x4xf32>
    %124 = tpu.matmul %123, %114, %cst_32 {dimension_numbers = #tpu.dot_dimension_numbers<[1], [0], [0], [1], [0, 0, 1, 1], [], []>} : vector<8x8xbf16>, vector<8x4xbf16>, vector<8x4xf32> -> vector<8x4xf32>
    %125 = tpu.reciprocal %122 {approx = true} : vector<8x1xf32> -> vector<8x1xf32>
    %126 = vector.broadcast %125 : vector<8x1xf32> to vector<8x4xf32>
    %127 = arith.mulf %124, %126 : vector<8x4xf32>
    %128 = arith.truncf %127 : vector<8x4xf32> to vector<8x4xbf16>
    %129 = vector.extract_strided_slice %12 {offsets = [0, 20], sizes = [8, 4], strides = [1, 1]} : vector<8x32xf32> to vector<8x4xf32>
    %130 = arith.truncf %129 : vector<8x4xf32> to vector<8x4xbf16>
    %131 = vector.extract_strided_slice %20 {offsets = [0, 20], sizes = [8, 4], strides = [1, 1]} : vector<8x32xf32> to vector<8x4xf32>
    %132 = arith.truncf %131 : vector<8x4xf32> to vector<8x4xbf16>
    %133 = vector.extract_strided_slice %28 {offsets = [0, 20], sizes = [8, 4], strides = [1, 1]} : vector<8x32xf32> to vector<8x4xf32>
    %134 = arith.truncf %133 : vector<8x4xf32> to vector<8x4xbf16>
    %cst_33 = arith.constant dense<0.000000e+00> : vector<8x8xf32>
    %135 = tpu.matmul %130, %132, %cst_33 {dimension_numbers = #tpu.dot_dimension_numbers<[1], [1], [0], [0], [0, 0, 1, 0], [], []>} : vector<8x4xbf16>, vector<8x4xbf16>, vector<8x8xf32> -> vector<8x8xf32>
    %cst_34 = arith.constant dense<0xFF800000> : vector<8xf32>
    %136 = vector.multi_reduction <maximumf>, %135, %cst_34 [1] : vector<8x8xf32> to vector<8xf32>
    %137 = vector.shape_cast %136 : vector<8xf32> to vector<8x1xf32>
    %138 = vector.broadcast %137 : vector<8x1xf32> to vector<8x8xf32>
    %139 = arith.subf %135, %138 : vector<8x8xf32>
    %140 = math.exp %139 : vector<8x8xf32>
    %cst_35 = arith.constant dense<0.000000e+00> : vector<8xf32>
    %141 = vector.multi_reduction <add>, %140, %cst_35 [1] : vector<8x8xf32> to vector<8xf32>
    %142 = vector.shape_cast %141 : vector<8xf32> to vector<8x1xf32>
    %143 = arith.truncf %140 : vector<8x8xf32> to vector<8x8xbf16>
    %cst_36 = arith.constant dense<0.000000e+00> : vector<8x4xf32>
    %144 = tpu.matmul %143, %134, %cst_36 {dimension_numbers = #tpu.dot_dimension_numbers<[1], [0], [0], [1], [0, 0, 1, 1], [], []>} : vector<8x8xbf16>, vector<8x4xbf16>, vector<8x4xf32> -> vector<8x4xf32>
    %145 = tpu.reciprocal %142 {approx = true} : vector<8x1xf32> -> vector<8x1xf32>
    %146 = vector.broadcast %145 : vector<8x1xf32> to vector<8x4xf32>
    %147 = arith.mulf %144, %146 : vector<8x4xf32>
    %148 = arith.truncf %147 : vector<8x4xf32> to vector<8x4xbf16>
    %149 = vector.extract_strided_slice %12 {offsets = [0, 24], sizes = [8, 4], strides = [1, 1]} : vector<8x32xf32> to vector<8x4xf32>
    %150 = arith.truncf %149 : vector<8x4xf32> to vector<8x4xbf16>
    %151 = vector.extract_strided_slice %20 {offsets = [0, 24], sizes = [8, 4], strides = [1, 1]} : vector<8x32xf32> to vector<8x4xf32>
    %152 = arith.truncf %151 : vector<8x4xf32> to vector<8x4xbf16>
    %153 = vector.extract_strided_slice %28 {offsets = [0, 24], sizes = [8, 4], strides = [1, 1]} : vector<8x32xf32> to vector<8x4xf32>
    %154 = arith.truncf %153 : vector<8x4xf32> to vector<8x4xbf16>
    %cst_37 = arith.constant dense<0.000000e+00> : vector<8x8xf32>
    %155 = tpu.matmul %150, %152, %cst_37 {dimension_numbers = #tpu.dot_dimension_numbers<[1], [1], [0], [0], [0, 0, 1, 0], [], []>} : vector<8x4xbf16>, vector<8x4xbf16>, vector<8x8xf32> -> vector<8x8xf32>
    %cst_38 = arith.constant dense<0xFF800000> : vector<8xf32>
    %156 = vector.multi_reduction <maximumf>, %155, %cst_38 [1] : vector<8x8xf32> to vector<8xf32>
    %157 = vector.shape_cast %156 : vector<8xf32> to vector<8x1xf32>
    %158 = vector.broadcast %157 : vector<8x1xf32> to vector<8x8xf32>
    %159 = arith.subf %155, %158 : vector<8x8xf32>
    %160 = math.exp %159 : vector<8x8xf32>
    %cst_39 = arith.constant dense<0.000000e+00> : vector<8xf32>
    %161 = vector.multi_reduction <add>, %160, %cst_39 [1] : vector<8x8xf32> to vector<8xf32>
    %162 = vector.shape_cast %161 : vector<8xf32> to vector<8x1xf32>
    %163 = arith.truncf %160 : vector<8x8xf32> to vector<8x8xbf16>
    %cst_40 = arith.constant dense<0.000000e+00> : vector<8x4xf32>
    %164 = tpu.matmul %163, %154, %cst_40 {dimension_numbers = #tpu.dot_dimension_numbers<[1], [0], [0], [1], [0, 0, 1, 1], [], []>} : vector<8x8xbf16>, vector<8x4xbf16>, vector<8x4xf32> -> vector<8x4xf32>
    %165 = tpu.reciprocal %162 {approx = true} : vector<8x1xf32> -> vector<8x1xf32>
    %166 = vector.broadcast %165 : vector<8x1xf32> to vector<8x4xf32>
    %167 = arith.mulf %164, %166 : vector<8x4xf32>
    %168 = arith.truncf %167 : vector<8x4xf32> to vector<8x4xbf16>
    %169 = vector.extract_strided_slice %12 {offsets = [0, 28], sizes = [8, 4], strides = [1, 1]} : vector<8x32xf32> to vector<8x4xf32>
    %170 = arith.truncf %169 : vector<8x4xf32> to vector<8x4xbf16>
    %171 = vector.extract_strided_slice %20 {offsets = [0, 28], sizes = [8, 4], strides = [1, 1]} : vector<8x32xf32> to vector<8x4xf32>
    %172 = arith.truncf %171 : vector<8x4xf32> to vector<8x4xbf16>
    %173 = vector.extract_strided_slice %28 {offsets = [0, 28], sizes = [8, 4], strides = [1, 1]} : vector<8x32xf32> to vector<8x4xf32>
    %174 = arith.truncf %173 : vector<8x4xf32> to vector<8x4xbf16>
    %cst_41 = arith.constant dense<0.000000e+00> : vector<8x8xf32>
    %175 = tpu.matmul %170, %172, %cst_41 {dimension_numbers = #tpu.dot_dimension_numbers<[1], [1], [0], [0], [0, 0, 1, 0], [], []>} : vector<8x4xbf16>, vector<8x4xbf16>, vector<8x8xf32> -> vector<8x8xf32>
    %cst_42 = arith.constant dense<0xFF800000> : vector<8xf32>
    %176 = vector.multi_reduction <maximumf>, %175, %cst_42 [1] : vector<8x8xf32> to vector<8xf32>
    %177 = vector.shape_cast %176 : vector<8xf32> to vector<8x1xf32>
    %178 = vector.broadcast %177 : vector<8x1xf32> to vector<8x8xf32>
    %179 = arith.subf %175, %178 : vector<8x8xf32>
    %180 = math.exp %179 : vector<8x8xf32>
    %cst_43 = arith.constant dense<0.000000e+00> : vector<8xf32>
    %181 = vector.multi_reduction <add>, %180, %cst_43 [1] : vector<8x8xf32> to vector<8xf32>
    %182 = vector.shape_cast %181 : vector<8xf32> to vector<8x1xf32>
    %183 = arith.truncf %180 : vector<8x8xf32> to vector<8x8xbf16>
    %cst_44 = arith.constant dense<0.000000e+00> : vector<8x4xf32>
    %184 = tpu.matmul %183, %174, %cst_44 {dimension_numbers = #tpu.dot_dimension_numbers<[1], [0], [0], [1], [0, 0, 1, 1], [], []>} : vector<8x8xbf16>, vector<8x4xbf16>, vector<8x4xf32> -> vector<8x4xf32>
    %185 = tpu.reciprocal %182 {approx = true} : vector<8x1xf32> -> vector<8x1xf32>
    %186 = vector.broadcast %185 : vector<8x1xf32> to vector<8x4xf32>
    %187 = arith.mulf %184, %186 : vector<8x4xf32>
    %188 = arith.truncf %187 : vector<8x4xf32> to vector<8x4xbf16>
    %189 = tpu.concatenate %48, %68, %88, %108, %128, %148, %168, %188 in 1 : vector<8x4xbf16>, vector<8x4xbf16>, vector<8x4xbf16>, vector<8x4xbf16>, vector<8x4xbf16>, vector<8x4xbf16>, vector<8x4xbf16>, vector<8x4xbf16> -> vector<8x32xbf16>
    %c0_45 = arith.constant 0 : index
    %c0_46 = arith.constant 0 : index
    %190 = vector.load %arg10[%c0_45, %c0_46] : memref<8x32xbf16, #tpu.memory_space<vmem>>, vector<8x32xbf16>
    tpu.vector_store %arg10[%c0_45, %c0_46], %189 {strides = array<i32>} : memref<8x32xbf16, #tpu.memory_space<vmem>>, vector<8x32xbf16>,
    %c0_i32 = arith.constant 0 : i32
    %191 = arith.cmpi eq, %arg1, %c0_i32 : i32
    %192 = arith.extui %191 : i1 to i32
    %c0_i32_47 = arith.constant 0 : i32
    %193 = arith.cmpi ne, %192, %c0_i32_47 : i32
    scf.if %193 {
      %c0_48 = arith.constant 0 : index
      %c0_49 = arith.constant 0 : index
      %194 = vector.load %arg10[%c0_48, %c0_49] : memref<8x32xbf16, #tpu.memory_space<vmem>>, vector<8x32xbf16>
      %c0_50 = arith.constant 0 : index
      %c0_51 = arith.constant 0 : index
      %195 = vector.load %arg7[%c0_50, %c0_51] : memref<32x32xbf16, #tpu.memory_space<vmem>>, vector<32x32xbf16>
      %cst_52 = arith.constant dense<0.000000e+00> : vector<8x32xf32>
      %196 = tpu.matmul %194, %195, %cst_52 {dimension_numbers = #tpu.dot_dimension_numbers<[1], [0], [0], [1], [0, 0, 1, 1], [], []>} : vector<8x32xbf16>, vector<32x32xbf16>, vector<8x32xf32> -> vector<8x32xf32>
      %c0_53 = arith.constant 0 : index
      %c0_54 = arith.constant 0 : index
      %197 = vector.load %arg8[%c0_53, %c0_54] : memref<1x32xf32, #tpu.memory_space<vmem>>, vector<1x32xf32>
      %198 = vector.broadcast %197 : vector<1x32xf32> to vector<8x32xf32>
      %199 = arith.addf %196, %198 : vector<8x32xf32>
      %c0_55 = arith.constant 0 : index
      %c0_56 = arith.constant 0 : index
      %c0_57 = arith.constant 0 : index
      %200 = vector.load %arg9[%c0_55, %c0_56, %c0_57] : memref<1x8x32xf32, #tpu.memory_space<vmem>>, vector<1x8x32xf32>
      %201 = vector.shape_cast %200 : vector<1x8x32xf32> to vector<8x32xf32>
      %202 = vector.shape_cast %199 : vector<8x32xf32> to vector<1x8x32xf32>
      tpu.vector_store %arg9[%c0_55, %c0_56, %c0_57], %202 {strides = array<i32>} : memref<1x8x32xf32, #tpu.memory_space<vmem>>, vector<1x8x32xf32>,
    } else {
    }
    return
  }
  func.func @transform_0(%arg0: i32, %arg1: i32) -> (i32, i32, i32) {
    %c0_i32 = arith.constant 0 : i32
    %c0_i32_0 = arith.constant 0 : i32
    %c0_i32_1 = arith.constant 0 : i32
    return %arg0, %c0_i32, %c0_i32_0 : i32, i32, i32
  }
  func.func @transform_1(%arg0: i32, %arg1: i32) -> (i32, i32, i32) {
    %c0_i32 = arith.constant 0 : i32
    %c0_i32_0 = arith.constant 0 : i32
    %c0_i32_1 = arith.constant 0 : i32
    %c0_i32_2 = arith.constant 0 : i32
    return %c0_i32, %c0_i32_0, %c0_i32_1 : i32, i32, i32
  }
  func.func @transform_2(%arg0: i32, %arg1: i32) -> (i32, i32, i32) {
    %c0_i32 = arith.constant 0 : i32
    %c0_i32_0 = arith.constant 0 : i32
    %c0_i32_1 = arith.constant 0 : i32
    %c0_i32_2 = arith.constant 0 : i32
    return %c0_i32, %c0_i32_0, %c0_i32_1 : i32, i32, i32
  }
  func.func @transform_3(%arg0: i32, %arg1: i32) -> (i32, i32, i32) {
    %c0_i32 = arith.constant 0 : i32
    %c0_i32_0 = arith.constant 0 : i32
    %c0_i32_1 = arith.constant 0 : i32
    %c0_i32_2 = arith.constant 0 : i32
    return %c0_i32, %c0_i32_0, %c0_i32_1 : i32, i32, i32
  }
  func.func @transform_4(%arg0: i32, %arg1: i32) -> (i32, i32, i32, i32) {
    %c0_i32 = arith.constant 0 : i32
    %c0_i32_0 = arith.constant 0 : i32
    %c0_i32_1 = arith.constant 0 : i32
    %c0_i32_2 = arith.constant 0 : i32
    %c0_i32_3 = arith.constant 0 : i32
    return %c0_i32, %c0_i32_0, %c0_i32_1, %c0_i32_2 : i32, i32, i32, i32
  }
  func.func @transform_5(%arg0: i32, %arg1: i32) -> (i32, i32) {
    %c0_i32 = arith.constant 0 : i32
    %c0_i32_0 = arith.constant 0 : i32
    %c0_i32_1 = arith.constant 0 : i32
    return %c0_i32, %c0_i32_0 : i32, i32
  }
  func.func @transform_6(%arg0: i32, %arg1: i32) -> (i32, i32) {
    %c0_i32 = arith.constant 0 : i32
    %c0_i32_0 = arith.constant 0 : i32
    %c0_i32_1 = arith.constant 0 : i32
    return %c0_i32, %c0_i32_0 : i32, i32
  }
  func.func @transform_7(%arg0: i32, %arg1: i32) -> (i32, i32, i32) {
    %c0_i32 = arith.constant 0 : i32
    %c0_i32_0 = arith.constant 0 : i32
    %c0_i32_1 = arith.constant 0 : i32
    return %arg0, %c0_i32, %c0_i32_0 : i32, i32, i32
  }
}

</mosaic_0001>

<bundles_post_ra>
// kernel: tpu_custom_call.1
= control target key start
LH: loop header
LB: loop body
LE: loop exit
PB: predicated region body
PF: predicated region fallthrough
CT: control target
= control target key end

     0   :  { %s2893_s0 = inlined_call_operand.hbm [shape: bf16[2,8,32], index: 0, kind: input, shape index: {}]   ;;  %s2894_s1 = inlined_call_operand.hbm [shape: bf16[1,32,32], index: 1, kind: input, shape index: {}]   ;;  %s2895_s2 = inlined_call_operand.hbm [shape: bf16[1,32,32], index: 2, kind: input, shape index: {}]   ;;  %s2896_s3 = inlined_call_operand.hbm [shape: bf16[1,32,32], index: 3, kind: input, shape index: {}]   ;;  %s2897_s4 = inlined_call_operand.hbm [shape: f32[1,3,1,32], index: 4, kind: input, shape index: {}]   ;;  %s2898_s5 = inlined_call_operand.vmem [shape: bf16[32,32], index: 5, kind: input, shape index: {}]   ;;  %s2899_s6 = inlined_call_operand.vmem [shape: f32[1,32], index: 6, kind: input, shape index: {}]   ;;  %s2900_s7 = inlined_call_operand.hbm [shape: f32[2,8,32], index: 7, kind: output, shape index: {}]  }
   0x1   :  { %2907 = sst [smem:[#allocation17_spill]] %s2894_s1 }
   0x2   :  { %2908 = sst [smem:[#allocation18_spill]] %s2900_s7 }
   0x3   :  { %12 = vsyncpa [#allocation4], 0 }
   0x4   :  { %14 = vsyncpa [#allocation4 + $0x1], 0 }
   0x5   :  { %15 = vsyncpa [#allocation7], 0 }
   0x6   :  { %16 = vsyncpa [#allocation10], 0 }
   0x7   :  { %17 = vsyncpa [#allocation5], 0 }
   0x8   :  { %19 = vsyncpa [#allocation5 + $0x1], 0  ;;  %s2401_s24 = smov 0   ;;  %s2403_s25 = smov 0  }
   0x9   :  { %s2405_s26 = smov 0   ;;  %s2407_s27 = smov 0  }
   0xa   :  { %s2409_s28 = smov 0   ;;  %s2411_s29 = smov 0  }
   0xb LB: > { %s2901_s30 = sadd.s32 4294967295, %s2333_s29   ;;  %p1715_p0 = scmp.ge.s32.totalorder %s2333_s29, 1  ;;  %s2333_s29 = sphi %s2411_s29, %s25_s29   ;;  %s2329_s28 = sphi %s2409_s28, %s2931_s28   ;;  %s2325_s27 = sphi %s2407_s27, %s2930_s27   ;;  %s2321_s26 = sphi %s2405_s26, %s2929_s26   ;;  %s2317_s25 = sphi %s2403_s25, %s2928_s25   ;;  %s2313_s24 = sphi %s2401_s24, %s2927_s24  }
   0xc   : > { %p2435_p1 = scmp.eq.s32.totalorder %s2901_s30, 0  ;;  %p220_p2 = scmp.lt.s32.totalorder %s2333_s29, 3 }
   0xd   : > { %s2335_s10 = smov [#allocation6]   ;;  %s2336_s13 = smov [#allocation9]  }
   0xe   : > { %s2909_s8 = scalar_select %p2435_p1, 1, 0 }
   0xf   : > { %p2440_p3 = pnand %p1715_p0, %p220_p2  ;;  %s232_s11 = sshll.u32 %s2335_s10, 4  ;;  %s2444_s11 = int_to_ptr.vmem [resolvable:$true] %s232_s11 }
  0x10   : > { %s258_s14 = sshll.u32 %s2336_s13, 4  ;;  %s2337_s15 = smov [#allocation8]   ;;  %s2455_s14 = int_to_ptr.vmem [resolvable:$true] %s258_s14 }
  0x11   : > { %s2910_s9 = scalar_select %p2440_p3, 1, 0 }
  0x12   : > { %p1958_p4 = pneg %p2440_p3  ;;  %s2457_s16 = sshll.u32 %s2337_s15, 4  ;;  %s246_s16 = int_to_ptr.vmem [resolvable:$true] %s2457_s16 }
  0x13   : > { %s2912_s1 = sld [smem:[#allocation17_spill]] }
  0x14   : > { %p2451_p6 = pnand %p1958_p4, %p2435_p1 }
  0x16   : > { %p2467_p8 = pneg %p2451_p6 }
  0x19   : > { %s2101_s19 = scalar_lea.hbm %s2912_s1, 256 }
  0x1a   : > { %p2102_p7 = scmp.ne.s32.totalorder %s2912_s1, %s2101_s19  ;;  %p2108_p11 = scmp.lt.u32.totalorder %s2101_s19, %s2912_s1 }
  0x1c   : > { %p2104_p9 = pnand %p2467_p8, %p2102_p7 }
  0x1e   : > { %p2105_p10 = pneg %p2104_p9 }
  0x20   : > { %p2110_p12 = pnand %p2108_p11, %p2105_p10 }
  0x22   : > { %2113 = shalt.err (!%p2110_p12)
}
  0x23   : > { %s2114_s13 = scalar_lea.vmem %s2444_s11, 256  ;;  %p2122_p4 = scmp.lt.s32.totalorder %s2444_s11, %s2444_s11 }
  0x24   : > { %p2115_p13 = scmp.ne.s32.totalorder %s2444_s11, %s2114_s13  ;;  %p2123_p5 = scmp.lt.s32.totalorder %s2114_s13, %s2114_s13 }
  0x26   : > { %p2117_p0 = pnand %p2115_p13, %p2467_p8  ;;  %p2124_p7 = por %p2123_p5, %p2122_p4 }
  0x28   : > { %p2118_p2 = pneg %p2117_p0 }
  0x2a   : > { %p2125_p9 = pnand %p2124_p7, %p2118_p2 }
  0x2c   : > { %2128 = shalt.err (!%p2125_p9)
}
  0x2d   : > { %s2338_s15 = smov 64   ;;  %s2339_s17 = smov 4  }
  0x2e   : > { %1961 = dma.hbm_to_vmem [thread:$0]  (!%p2451_p6), %s2912_s1, 256, %s2444_s11, [#allocation7], %s2338_s15, %s2338_s15, %s2339_s17  }
  0x2f   : > { %s2129_s23 = scalar_lea.hbm %s2896_s3, 256 }
  0x30   : > { %p2130_p5 = scmp.ne.s32.totalorder %s2896_s3, %s2129_s23  ;;  %p2136_p12 = scmp.lt.u32.totalorder %s2129_s23, %s2896_s3 }
  0x32   : > { %p2132_p10 = pnand %p2130_p5, %p2467_p8 }
  0x34   : > { %p2133_p11 = pneg %p2132_p10 }
  0x36   : > { %p2138_p13 = pnand %p2136_p12, %p2133_p11 }
  0x38   : > { %2141 = shalt.err (!%p2138_p13)
}
  0x39   : > { %s2142_s11 = scalar_lea.vmem %s2455_s14, 256  ;;  %p2150_p7 = scmp.lt.s32.totalorder %s2455_s14, %s2455_s14 }
  0x3a   : > { %p2143_p0 = scmp.ne.s32.totalorder %s2455_s14, %s2142_s11  ;;  %p2151_p9 = scmp.lt.s32.totalorder %s2142_s11, %s2142_s11 }
  0x3c   : > { %p2145_p2 = pnand %p2143_p0, %p2467_p8  ;;  %p2152_p5 = por %p2151_p9, %p2150_p7 }
  0x3e   : > { %p2146_p4 = pneg %p2145_p2 }
  0x40   : > { %p2153_p10 = pnand %p2152_p5, %p2146_p4 }
  0x42   : > { %2156 = shalt.err (!%p2153_p10)
}
  0x43   : > { %1967 = dma.hbm_to_vmem [thread:$0]  (!%p2451_p6), %s2896_s3, 256, %s2455_s14, [#allocation10], %s2338_s15, %s2338_s15, %s2339_s17  }
  0x44   : > { %s2157_s20 = scalar_lea.hbm %s2895_s2, 256 }
  0x45   : > { %p2158_p11 = scmp.ne.s32.totalorder %s2895_s2, %s2157_s20  ;;  %p2164_p0 = scmp.lt.u32.totalorder %s2157_s20, %s2895_s2 }
  0x47   : > { %p2160_p12 = pnand %p2158_p11, %p2467_p8 }
  0x49   : > { %p2161_p13 = pneg %p2160_p12 }
  0x4b   : > { %p2166_p2 = pnand %p2164_p0, %p2161_p13 }
  0x4d   : > { %2169 = shalt.err (!%p2166_p2)
}
  0x4e   : > { %s2170_s11 = scalar_lea.vmem %s246_s16, 256  ;;  %p2178_p5 = scmp.lt.s32.totalorder %s246_s16, %s246_s16 }
  0x4f   : > { %p2171_p4 = scmp.ne.s32.totalorder %s246_s16, %s2170_s11  ;;  %p2179_p10 = scmp.lt.s32.totalorder %s2170_s11, %s2170_s11 }
  0x51   : > { %p2173_p7 = pnand %p2171_p4, %p2467_p8  ;;  %p2180_p3 = por %p2179_p10, %p2178_p5 }
  0x53   : > { %p2174_p9 = pneg %p2173_p7 }
  0x55   : > { %p2181_p1 = pnand %p2180_p3, %p2174_p9 }
  0x57   : > { %2184 = shalt.err (!%p2181_p1)
}
  0x58   : > { %1964 = dma.hbm_to_vmem [thread:$0]  (!%p2451_p6), %s2895_s2, 256, %s246_s16, [#allocation7], %s2338_s15, %s2338_s15, %s2339_s17  }
  0x59   : > { %s2340_s30 = smov [#allocation11]   ;;  %s2185_s21 = scalar_lea.hbm %s2897_s4, 48 }
  0x5a   : > { %s271_s18 = sshll.u32 %s2340_s30, 4  ;;  %p2186_p1 = scmp.ne.s32.totalorder %s2897_s4, %s2185_s21  ;;  %s272_s18 = int_to_ptr.vmem [resolvable:$true] %s271_s18 }
  0x5b   : > { %p2192_p12 = scmp.lt.u32.totalorder %s2185_s21, %s2897_s4 }
  0x5c   : > { %p2188_p3 = pnand %p2186_p1, %p2467_p8 }
  0x5e   : > { %p2189_p11 = pneg %p2188_p3 }
  0x60   : > { %p2194_p13 = pnand %p2192_p12, %p2189_p11 }
  0x62   : > { %2197 = shalt.err (!%p2194_p13)
}
  0x63   : > { %s2198_s16 = scalar_lea.vmem %s272_s18, 48  ;;  %s2205_s15 = scalar_lea.vmem %s272_s18, 64 }
  0x64   : > { %p2199_p0 = scmp.ne.s32.totalorder %s272_s18, %s2198_s16  ;;  %p2206_p7 = scmp.lt.s32.totalorder %s272_s18, %s272_s18 }
  0x65   : > { %p2207_p9 = scmp.lt.s32.totalorder %s2205_s15, %s2198_s16 }
  0x66   : > { %p2201_p2 = pnand %p2199_p0, %p2467_p8 }
  0x67   : > { %p2208_p5 = por %p2207_p9, %p2206_p7 }
  0x68   : > { %p2202_p4 = pneg %p2201_p2 }
  0x6a   : > { %p2209_p10 = pnand %p2208_p5, %p2202_p4 }
  0x6c   : > { %2212 = shalt.err (!%p2209_p10)
}
  0x6d   : > { %s2341_s17 = smov 16   ;;  %s2342_s22 = smov 1  }
  0x6e   : > { %1970 = dma.hbm_to_vmem [thread:$0]  (!%p2451_p6), %s2897_s4, 48, %s272_s18, [#allocation10], %s2341_s17, %s2341_s17, %s2342_s22  }
  0x6f   : > { %s1714_s30 = sadd.s32 4294967294, %s2333_s29   ;;  %s37_s19 = sadd.s32 1, %s2329_s28 }
  0x70   : > { %p39_p8 = scmp.ge.s32.totalorder %s37_s19, 2  ;;  %s44_s20 = sadd.s32 1, %s2321_s26 }
  0x71   : > { %p51_p1 = scmp.ne.s32.totalorder %s2321_s26, %s2317_s25  ;;  %p52_p3 = scmp.eq.s32.totalorder %s2333_s29, 0 }
  0x72   : > { %s2933_s19 = smov (%p39_p8, %s37_s19), 0  ;;  %p57_p12 = scmp.ne.s32.totalorder %s2317_s25, %s2313_s24 }
  0x73   : > { %p2565_p11 = por %p52_p3, %p51_p1  ;;  %s41_s12 = ssub.s32 %s2329_s28, %s2933_s19 }
  0x74   : > { %s2915_s18 = sadd.s32 4294967295, %s2333_s29   ;;  %p42_p13 = scmp.eq.s32.totalorder %s41_s12, 0 }
  0x75   : > { %p207_p6 = scmp.eq.s32.totalorder %s2915_s18, 1  ;;  %p2916_p0 = scmp.ne.s32.totalorder %s2909_s8, 0 }
  0x76   : > { %p213_p7 = scmp.eq.s32.totalorder %s1714_s30, 1  ;;  %p1983_p5 = scmp.lt.s32.totalorder %s2333_s29, 2 }
  0x77   : > { %p2577_p2 = por %p2916_p0, %p57_p12  ;;  %p2581_p4 = por %p207_p6, %p51_p1 }
  0x78   : > { %s2586_s13 = scalar_select %p42_p13, %s2321_s26, %s44_s20  }
  0x79   : > { %s2918_s10 = scalar_select %p2581_p4, 1, 0 }
  0x7a   : > { %p2588_p9 = por %p213_p7, %p57_p12  ;;  %s291_s16 = sand.u32 1, %s2321_s26  }
  0x7b   : > { %s1722_s15 = sshll.u32 %s2329_s28, 6  ;;  %s1721_s17 = sshll.u32 %s291_s16, 2 }
  0x7c   : > { %s2919_s11 = scalar_select %p2588_p9, 1, 0 }
  0x7d   : > { %s2598_s7 = scalar_lea.hbm %s2893_s0, %s1722_s15  ;;  %s295_s30 = scalar_lea.vmem [#allocation3], %s1721_s17 }
  0x7e   : > { %s302_s20 = sshll.u32 %s295_s30, 4  ;;  %p2602_p10 = pnand %p1983_p5, %p2565_p11  ;;  %s2606_s20 = int_to_ptr.vmem [resolvable:$true] %s302_s20 }
  0x7f   : > { %s292_s18 = scalar_lea.sflag [#allocation4], %s291_s16  ;;  %s2213_s1 = scalar_lea.hbm %s2598_s7, 64 }
  0x80   : > { %p2214_p8 = scmp.ne.s32.totalorder %s2598_s7, %s2213_s1  ;;  %p2215_p1 = pneg %p2602_p10 }
  0x81   : > { %s2218_s21 = scalar_lea.hbm %s2893_s0, 128  ;;  %p2219_p11 = scmp.lt.u32.totalorder %s2598_s7, %s2893_s0 }
  0x82   : > { %p2216_p3 = pnand %p2215_p1, %p2214_p8  ;;  %p2220_p6 = scmp.lt.u32.totalorder %s2218_s21, %s2213_s1 }
  0x83   : > { %p2222_p0 = scmp.lt.u32.totalorder %s2213_s1, %s2598_s7 }
  0x84   : > { %p2217_p12 = pneg %p2216_p3  ;;  %p2221_p13 = por %p2220_p6, %p2219_p11 }
  0x86   : > { %p2223_p7 = por %p2222_p0, %p2221_p13 }
  0x88   : > { %p2224_p5 = pnand %p2223_p7, %p2217_p12 }
  0x8a   : > { %2227 = shalt.err (!%p2224_p5)
}
  0x8b   : > { %s2228_s16 = scalar_lea.vmem %s2606_s20, 64  ;;  %s2343_s30 = smov [#allocation3]  }
  0x8c   : > { %p2229_p8 = scmp.ne.s32.totalorder %s2606_s20, %s2228_s16  ;;  %s2233_s15 = sshll.u32 %s2343_s30, 4  ;;  %s2234_s15 = int_to_ptr.vmem [resolvable:$false] %s2233_s15 }
  0x8d   : > { %s2235_s17 = scalar_lea.vmem %s2234_s15, 128  ;;  %p2236_p4 = scmp.lt.s32.totalorder %s2606_s20, %s2234_s15 }
  0x8e   : > { %p2231_p3 = pnand %p2229_p8, %p2215_p1  ;;  %p2237_p11 = scmp.lt.s32.totalorder %s2235_s17, %s2228_s16 }
  0x90   : > { %p2232_p9 = pneg %p2231_p3  ;;  %p2238_p6 = por %p2237_p11, %p2236_p4 }
  0x92   : > { %p2239_p13 = pnand %p2238_p6, %p2232_p9 }
  0x94   : > { %2242 = shalt.err (!%p2239_p13)
}
  0x95   : > { %1974 = dma.hbm_to_vmem [thread:$0]  (!%p2602_p10), %s2598_s7, 64, %s2606_s20, %s292_s18  }
  0x96   : > { %p2921_p12 = scmp.ne.s32.totalorder %s2910_s9, 0 }
  0x97   : > { %s2636_s1 = sand.u32 (!%p2921_p12), 1, %s2317_s25  }
  0x98   : > { %311 = sbr.rel (%p2921_p12) target bundleno = 1531 (0x5fb), region = 48  ;;  %s1724_s21 = sshll.u32 (!%p2921_p12), %s2636_s1, 2 }
  0x99   : > { %s314_s22 = scalar_lea.sflag (!%p2921_p12), [#allocation4], %s2636_s1  ;;  %s317_s14 = scalar_lea.vmem (!%p2921_p12), [#allocation3], %s1724_s21 }
  0x9f   : > { %2296 = dma.done.wait (%p2577_p2), %s314_s22, 64  }
  0xa0   : > { %2298 = vsyncadd (%p2577_p2), %s314_s22, 4294967232  ;;  %p2922_p4 = scmp.ne.s32.totalorder %s2909_s8, 0 }
  0xa2   : > { %2300 = dma.done.wait (%p2922_p4), [#allocation7], 512  }
  0xa3   : > { %2302 = vsyncadd (%p2922_p4), [#allocation7], 4294966784 }
  0xa4   : > { %2304 = dma.done.wait (%p2922_p4), [#allocation10], 304  }
  0xa5   : > { %2306 = vsyncadd (%p2922_p4), [#allocation10], 4294966992  ;;  %v2344_v0 = vmov 0.0   ;;  %vm2345_vm0 = vmmov 0   ;;  %v2061_v1 = vld [vmem:[#allocation8] sm:$0xff]   ;;  %v2062_v2 = vld [vmem:[#allocation6] sm:$0xff]  }
  0xa6   : > { %1818 = vmatprep.subr.bf16.mxu1 %v2344_v0  ;;  %1810 = vmatprep.subr.bf16.mxu0 %v2344_v0  ;;  %v2063_v3 = vld [vmem:[#allocation8 + $0x8] sm:$0xff]   ;;  %v2064_v4 = vld [vmem:[#allocation6 + $0x8] sm:$0xff]   ;;  %vm396_vm1 = vcmask 261120   ;;  %v2065_v6 = vld [vmem:[#allocation9] sm:$0xff]   ;;  %vm571_vm2 = vcmask 31744   ;;  %s2346_s8 = smov 120  }
  0xa7   : > { %1822 = vmatprep.mubr.msk.bf16.mxu1 %vm2345_vm0, %v2344_v0  ;;  %1814 = vmatprep.mubr.msk.bf16.mxu0 %vm2345_vm0, %v2344_v0  ;;  %v365_v5 = vld [vmem:[%s317_s14] sm:$0xf]  ;;  %v2066_v7 = vld [vmem:[#allocation9 + $0x8] sm:$0xff]   ;;  %v1734_v8 = vld [vmem:[#allocation11 + $0x1] ss:$0 sm:$0xff]  ;;  %s2347_s9 = smov 124  }
  0xa8   : > { %1819 = vmatpush3.bf16.msra.mxu1 %v2061_v1  ;;  %1811 = vmatpush3.bf16.msra.mxu0 %v2062_v2  ;;  %v1730_v9 = vld [vmem:[#allocation11] ss:$0 sm:$0xff]  ;;  %s2348_s23 = smov 116   ;;  %s2349_s7 = smov 112   ;;  %v1738_v23 = vld [vmem:[#allocation11 + $0x2] ss:$0 sm:$0xff] }
  0xa9   : > { %1820 = vmatprep.subr.bf16.mxu1 %v2344_v0  ;;  %1812 = vmatprep.subr.bf16.mxu0 %v2344_v0  ;;  %s2350_s20 = smov 108   ;;  %s2351_s12 = smov 104   ;;  %vm632_vm3 = vcmask 1043456   ;;  %vm618_vm4 = vcmask 64512   ;;  %vm1485_vm5 = vcmask 97280   ;;  %vm1488_vm6 = vcmask 130048  }
  0xaa   : > { %s2352_s18 = smov 100   ;;  %s2353_s16 = smov 4   ;;  %vm1491_vm7 = vcmask 162816   ;;  %vm1494_vm8 = vcmask 195584   ;;  %vm1497_vm9 = vcmask 228352   ;;  %vm1501_vm10 = vcmask 257024  }
  0xab   : > { %s2354_s30 = smov 8   ;;  %s2355_s15 = smov 12  }
  0xac   : > { %1821 = vmatpush3.bf16.msra.mxu1 %v2063_v3  ;;  %1813 = vmatpush3.bf16.msra.mxu0 %v2064_v4  ;;  %s2356_s17 = smov 16   ;;  %s2357_s21 = smov 20  }
  0xad   : > { %1834 = vmatprep.subr.bf16.mxu1 %v2344_v0  ;;  %1826 = vmatprep.subr.bf16.mxu0 %v2344_v0  ;;  %s2923_s22 = sld [smem:[#allocation18_spill]]  ;;  %p2924_p9 = scmp.ne.s32.totalorder %s2918_s10, 0 }
  0xaf   : > { %1823 = vmatmul.mubr.msk.bf16.vlgmr.msra.gmra.mrb[0].mxu1 %vm396_vm1, %v365_v5  ;;  %1815 = vmatmul.mubr.msk.bf16.vlgmr.msra.gmra.mrb[0].mxu0 %vm396_vm1, %v365_v5 }
  0xb0   : > { %1836 = vmatprep.mubr.msk.bf16.mxu1 %vm2345_vm0, %v2344_v0  ;;  %1827 = vmatpush3.bf16.msra.mxu0 %v2065_v6 }
  0xb1   : > { %1830 = vmatprep.mubr.msk.bf16.mxu0 %vm2345_vm0, %v2344_v0  ;;  %1828 = vmatprep.subr.bf16.mxu0 %v2344_v0 }
  0xb4   : > { %1829 = vmatpush3.bf16.msra.mxu0 %v2066_v7 }
  0xb5   : > { %1840 = vmatprep.subr.bf16.mxu0 %v2344_v0 }
  0xb7   : > { %1831 = vmatmul.mubr.msk.bf16.vlgmr.msra.gmra.mrb[4].mxu0 %vm396_vm1, %v365_v5 }
  0xb8   : > { %1842 = vmatprep.mubr.msk.bf16.mxu0 %vm2345_vm0, %v2344_v0 }
 0x182   : > { %v498_v10 = vpop.f32.mrb[0].mxu1  ;;  %v434_v13 = vpop.f32.mrb[0].mxu0 }
 0x183   : > { %v499_v11 = vadd.f32 %v1734_v8, %v498_v10  ;;  %v1824_v12 = vpop.f32.mrb[1].mxu1  ;;  %v435_v15 = vadd.f32 %v1730_v9, %v434_v13  ;;  %v1816_v16 = vpop.f32.mrb[1].mxu0 }
 0x184   : > { %v501_v14 = vpop.f32.mrb[2].mxu1  ;;  %v437_v19 = vpop.f32.mrb[2].mxu0 }
 0x185   : > { %v569_v17 = vpack.c.bf16 %v499_v11, %v499_v11  ;;  %v1825_v18 = vpop.f32.mrb[3].mxu1  ;;  %v1817_v20 = vpop.f32.mrb[3].mxu0  ;;  %v568_v21 = vpack.c.bf16 %v435_v15, %v435_v15 }
 0x187   : > { %795 = vrot.lane.b32.xlu1 %v569_v17, %s2346_s8  ;;  %683 = vrot.lane.b32.xlu0 %v569_v17, %s2347_s9  ;;  %v576_v22 = vsel %vm571_vm2, %v569_v17, 0 }
 0x188   : > { %1835 = vmatpush3.bf16.xpose.msra.mxu1 %v576_v22 }
 0x189   : > { %1846 = vmatprep.subr.bf16.mxu1 %v2344_v0 }
 0x18a   : > { %v562_v24 = vpop.f32.mrb[4].mxu0 }
 0x18b   : > { %793 = vrot.lane.b32.xlu1 %v568_v21, %s2346_s8  ;;  %680 = vrot.lane.b32.xlu0 %v568_v21, %s2347_s9  ;;  %v563_v25 = vadd.f32 %v1738_v23, %v562_v24  ;;  %v1832_v26 = vpop.f32.mrb[5].mxu0 }
 0x18c   : > { %v565_v27 = vpop.f32.mrb[6].mxu0 }
 0x18d   : > { %v2692_v28 = vpack.c.bf16 %v563_v25, %v563_v25  ;;  %v1833_v29 = vpop.f32.mrb[7].mxu0 }
 0x18f   : > { %904 = vrot.lane.b32.xlu1 %v568_v21, %s2348_s23  ;;  %906 = vrot.lane.b32.xlu0 %v569_v17, %s2348_s23  ;;  %v634_v30 = vsel %vm632_vm3, %v2692_v28, 0 }
 0x190   : > { %1837 = vmatmul.mubr.msk.bf16.vlgmr.msra.gmra.mrb[4].mxu1 %vm571_vm2, %v568_v21  ;;  %1841 = vmatpush3.bf16.msra.mxu0 %v634_v30 }
 0x191   : > { %1848 = vmatprep.mubr.msk.bf16.mxu1 %vm2345_vm0, %v2344_v0  ;;  %1852 = vmatprep.subr.bf16.mxu0 %v2344_v0 }
 0x193   : > { %1015 = vrot.lane.b32.xlu1 %v568_v21, %s2349_s7  ;;  %1017 = vrot.lane.b32.xlu0 %v569_v17, %s2349_s7 }
 0x197   : > { %1126 = vrot.lane.b32.xlu1 %v568_v21, %s2350_s20  ;;  %1128 = vrot.lane.b32.xlu0 %v569_v17, %s2350_s20 }
 0x19b   : > { %1237 = vrot.lane.b32.xlu1 %v568_v21, %s2351_s12  ;;  %1239 = vrot.lane.b32.xlu0 %v569_v17, %s2351_s12 }
 0x19f   : > { %1348 = vrot.lane.b32.xlu1 %v568_v21, %s2352_s18  ;;  %1350 = vrot.lane.b32.xlu0 %v569_v17, %s2352_s18 }
 0x1a3   : > { %742 = vrot.lane.b32.xlu0 %v2692_v28, %s2347_s9  ;;  %853 = vrot.lane.b32.xlu1 %v2692_v28, %s2346_s8  ;;  %s2360_s9 = smov [#allocation12]  }
 0x1f9   : > { %v684_v31 = vpop.permute.xlu0 %683  ;;  %v796_v33 = vpop.permute.xlu1 %795 }
 0x1fa   : > { %v689_v32 = vsel %vm571_vm2, %v684_v31, 0  ;;  %v801_v35 = vsel %vm571_vm2, %v796_v33, 0 }
 0x1fb   : > { %1847 = vmatpush3.bf16.xpose.msra.mxu1 %v689_v32 }
 0x1fc   : > { %1858 = vmatprep.subr.bf16.mxu1 %v2344_v0 }
 0x1fd   : > { %v681_v34 = vpop.permute.xlu0 %680  ;;  %v794_v37 = vpop.permute.xlu1 %793 }
 0x201   : > { %v907_v36 = vpop.permute.xlu0 %906  ;;  %v905_v40 = vpop.permute.xlu1 %904 }
 0x202   : > { %1849 = vmatmul.mubr.msk.bf16.vlgmr.msra.gmra.mrb[8].mxu1 %vm571_vm2, %v681_v34  ;;  %v912_v38 = vsel %vm571_vm2, %v907_v36, 0 }
 0x203   : > { %1859 = vmatpush3.bf16.xpose.msra.mxu1 %v801_v35  ;;  %1860 = vmatprep.mubr.msk.bf16.mxu1 %vm2345_vm0, %v2344_v0 }
 0x204   : > { %1870 = vmatprep.subr.bf16.mxu1 %v2344_v0 }
 0x205   : > { %v1018_v39 = vpop.permute.xlu0 %1017  ;;  %v1016_v43 = vpop.permute.xlu1 %1015 }
 0x206   : > { %v1023_v41 = vsel %vm571_vm2, %v1018_v39, 0 }
 0x209   : > { %v1129_v42 = vpop.permute.xlu0 %1128  ;;  %v1127_v46 = vpop.permute.xlu1 %1126 }
 0x20a   : > { %1861 = vmatmul.mubr.msk.bf16.vlgmr.msra.gmra.mrb[12].mxu1 %vm571_vm2, %v794_v37  ;;  %v1134_v44 = vsel %vm571_vm2, %v1129_v42, 0 }
 0x20b   : > { %1871 = vmatpush3.bf16.xpose.msra.mxu1 %v912_v38  ;;  %1872 = vmatprep.mubr.msk.bf16.mxu1 %vm2345_vm0, %v2344_v0 }
 0x20c   : > { %1882 = vmatprep.subr.bf16.mxu1 %v2344_v0 }
 0x20d   : > { %v1240_v45 = vpop.permute.xlu0 %1239  ;;  %v1238_v49 = vpop.permute.xlu1 %1237 }
 0x20e   : > { %v1245_v47 = vsel %vm571_vm2, %v1240_v45, 0 }
 0x211   : > { %v1351_v48 = vpop.permute.xlu0 %1350  ;;  %v1349_v51 = vpop.permute.xlu1 %1348 }
 0x212   : > { %1873 = vmatmul.mubr.msk.bf16.vlgmr.msra.gmra.mrb[16].mxu1 %vm571_vm2, %v905_v40  ;;  %v1356_v50 = vsel %vm571_vm2, %v1351_v48, 0 }
 0x213   : > { %1883 = vmatpush3.bf16.xpose.msra.mxu1 %v1023_v41  ;;  %1884 = vmatprep.mubr.msk.bf16.mxu1 %vm2345_vm0, %v2344_v0 }
 0x214   : > { %1894 = vmatprep.subr.bf16.mxu1 %v2344_v0 }
 0x215   : > { %v743_v9 = vpop.permute.xlu0 %742  ;;  %v854_v37 = vpop.permute.xlu1 %853 }
 0x216   : > { %v748_v26 = vsel %vm632_vm3, %v743_v9, 0 }
 0x21a   : > { %1885 = vmatmul.mubr.msk.bf16.vlgmr.msra.gmra.mrb[20].mxu1 %vm571_vm2, %v1016_v43 }
 0x21b   : > { %1895 = vmatpush3.bf16.xpose.msra.mxu1 %v1134_v44  ;;  %1896 = vmatprep.mubr.msk.bf16.mxu1 %vm2345_vm0, %v2344_v0 }
 0x21c   : > { %1906 = vmatprep.subr.bf16.mxu1 %v2344_v0 }
 0x222   : > { %1897 = vmatmul.mubr.msk.bf16.vlgmr.msra.gmra.mrb[24].mxu1 %vm571_vm2, %v1127_v46 }
 0x223   : > { %1907 = vmatpush3.bf16.xpose.msra.mxu1 %v1245_v47  ;;  %1908 = vmatprep.mubr.msk.bf16.mxu1 %vm2345_vm0, %v2344_v0 }
 0x224   : > { %1918 = vmatprep.subr.bf16.mxu1 %v2344_v0 }
 0x22a   : > { %1909 = vmatmul.mubr.msk.bf16.vlgmr.msra.gmra.mrb[28].mxu1 %vm571_vm2, %v1238_v49  ;;  %v859_v49 = vsel %vm632_vm3, %v854_v37, 0 }
 0x22b   : > { %1919 = vmatpush3.bf16.xpose.msra.mxu1 %v1356_v50  ;;  %1920 = vmatprep.mubr.msk.bf16.mxu1 %vm2345_vm0, %v2344_v0 }
 0x22c   : > { %1930 = vmatprep.subr.bf16.mxu1 %v2344_v0 }
 0x232   : > { %1921 = vmatmul.mubr.msk.bf16.vlgmr.msra.gmra.mrb[32].mxu1 %vm571_vm2, %v1349_v51 }
 0x233   : > { %1934 = vmatprep.mubr.msk.bf16.mxu1 %vm2345_vm0, %v2344_v0 }
 0x263   : > { %v612_v52 = vpop.f32.mrb[4].mxu1 }
 0x264   : > { %v1838_v53 = vpop.f32.mrb[5].mxu1  ;;  %v619_v54 = vsel %vm618_vm4, %v612_v52, -inf }
 0x265   : > { %v615_v55 = vpop.f32.mrb[6].mxu1  ;;  %620 = vmax.xlane.f32.xlu0 %v619_v54 }
 0x266   : > { %v1839_v56 = vpop.f32.mrb[7].mxu1 }
 0x2d5   : > { %v725_v57 = vpop.f32.mrb[8].mxu1 }
 0x2d6   : > { %v1850_v58 = vpop.f32.mrb[9].mxu1  ;;  %v731_v59 = vsel %vm618_vm4, %v725_v57, -inf }
 0x2d7   : > { %v728_v60 = vpop.f32.mrb[10].mxu1  ;;  %732 = vmax.xlane.f32.xlu1 %v731_v59 }
 0x2d8   : > { %v1851_v61 = vpop.f32.mrb[11].mxu1 }
 0x2dd   : > { %v837_v62 = vpop.f32.mrb[12].mxu1 }
 0x2de   : > { %v1862_v63 = vpop.f32.mrb[13].mxu1  ;;  %v843_v1 = vsel %vm618_vm4, %v837_v62, -inf }
 0x2df   : > { %v840_v2 = vpop.f32.mrb[14].mxu1  ;;  %844 = vmax.xlane.f32.xlu0 %v843_v1 }
 0x2e0   : > { %v1863_v3 = vpop.f32.mrb[15].mxu1 }
 0x2e5   : > { %v2739_v4 = vpop.f32.mrb[16].mxu1 }
 0x2e6   : > { %v1874_v5 = vpop.f32.mrb[17].mxu1  ;;  %v954_v6 = vsel %vm618_vm4, %v2739_v4, -inf }
 0x2e7   : > { %v951_v7 = vpop.f32.mrb[18].mxu1  ;;  %955 = vmax.xlane.f32.xlu0 %v954_v6 }
 0x2e8   : > { %v1875_v8 = vpop.f32.mrb[19].mxu1  ;;  %964 = vrot.lane.b32.xlu1 %v2692_v28, %s2348_s23  ;;  %s2358_s23 = smov 24  }
 0x2ed   : > { %v2745_v10 = vpop.f32.mrb[20].mxu1 }
 0x2ee   : > { %v1886_v11 = vpop.f32.mrb[21].mxu1  ;;  %v1065_v33 = vsel %vm618_vm4, %v2745_v10, -inf }
 0x2ef   : > { %v1062_v12 = vpop.f32.mrb[22].mxu1 }
 0x2f0   : > { %v1887_v13 = vpop.f32.mrb[23].mxu1 }
 0x2f2   : > { %v621_v14 = vpop.xlane.xlu0 %620 }
 0x2f3   : > { %v622_v15 = vsub.f32 %v612_v52, %v621_v14 }
 0x2f5   : > { %v623_v16 = vmul.f32 1.442695, %v622_v15  ;;  %v2747_v17 = vpop.f32.mrb[24].mxu1 }
 0x2f6   : > { %v1898_v18 = vpop.f32.mrb[25].mxu1  ;;  %v1176_v34 = vsel %vm618_vm4, %v2747_v17, -inf }
 0x2f7   : > { %2069 = vpow2.f32 %v623_v16  ;;  %v1173_v19 = vpop.f32.mrb[26].mxu1 }
 0x2f8   : > { %v1899_v20 = vpop.f32.mrb[27].mxu1 }
 0x2fd   : > { %v2749_v21 = vpop.f32.mrb[28].mxu1  ;;  %1075 = vrot.lane.b32.xlu0 %v2692_v28, %s2349_s7  ;;  %s2359_s7 = smov 28  }
 0x2fe   : > { %v1910_v22 = vpop.f32.mrb[29].mxu1  ;;  %v1287_v36 = vsel %vm618_vm4, %v2749_v21, -inf }
 0x2ff   : > { %v1284_v23 = vpop.f32.mrb[30].mxu1 }
 0x300   : > { %v1911_v24 = vpop.f32.mrb[31].mxu1 }
 0x301   : > { %v2753_v25 = vpop.eup %2069 }
 0x302   : > { %v628_v27 = vpack.c.bf16 %v2753_v25, %v2753_v25 }
 0x304   : > { %1843 = vmatmul.mubr.msk.bf16.vlgmr.msra.gmra.mrb[8].mxu0 %vm618_vm4, %v628_v27  ;;  %v625_v27 = vsel %vm618_vm4, %v2753_v25, 0.0 }
 0x305   : > { %v2759_v29 = vpop.f32.mrb[32].mxu1  ;;  %1853 = vmatpush3.bf16.msra.mxu0 %v748_v26  ;;  %1854 = vmatprep.mubr.msk.bf16.mxu0 %vm2345_vm0, %v2344_v0 }
 0x306   : > { %v1922_v30 = vpop.f32.mrb[33].mxu1  ;;  %1864 = vmatprep.subr.bf16.mxu0 %v2344_v0  ;;  %v1398_v35 = vsel %vm618_vm4, %v2759_v29, -inf }
 0x307   : > { %v1395_v31 = vpop.f32.mrb[34].mxu1 }
 0x308   : > { %v1923_v32 = vpop.f32.mrb[35].mxu1 }
 0x30c   : > { %1066 = vmax.xlane.f32.xlu1 %v1065_v33 }
 0x310   : > { %1177 = vmax.xlane.f32.xlu1 %v1176_v34 }
 0x314   : > { %1399 = vmax.xlane.f32.xlu1 %v1398_v35 }
 0x31c   : > { %1288 = vmax.xlane.f32.xlu0 %v1287_v36 }
 0x325   : > { %1186 = vrot.lane.b32.xlu1 %v2692_v28, %s2350_s20  ;;  %s1729_s20 = sshll.u32 %s2636_s1, 3 }
 0x332   : > { %1297 = vrot.lane.b32.xlu0 %v2692_v28, %s2351_s12 }
 0x336   : > { %1408 = vrot.lane.b32.xlu0 %v2692_v28, %s2352_s18 }
 0x364   : > { %v733_v38 = vpop.xlane.xlu1 %732 }
 0x365   : > { %v734_v39 = vsub.f32 %v725_v57, %v733_v38 }
 0x367   : > { %v735_v40 = vmul.f32 1.442695, %v734_v39 }
 0x368   : > { %v965_v51 = vpop.permute.xlu1 %964 }
 0x369   : > { %2071 = vpow2.f32 %v735_v40  ;;  %v970_v54 = vsel %vm632_vm3, %v965_v51, 0 }
 0x36c   : > { %v845_v41 = vpop.xlane.xlu0 %844 }
 0x36d   : > { %v846_v42 = vsub.f32 %v837_v62, %v845_v41 }
 0x36f   : > { %v847_v43 = vmul.f32 1.442695, %v846_v42 }
 0x371   : > { %2073 = vpow2.f32 %v847_v43 }
 0x373   : > { %v2072_v44 = vpop.eup %2071 }
 0x374   : > { %v956_v45 = vpop.xlane.xlu0 %955  ;;  %v737_v46 = vsel %vm618_vm4, %v2072_v44, 0.0  ;;  %v740_v47 = vpack.c.bf16 %v2072_v44, %v2072_v44 }
 0x375   : > { %v957_v48 = vsub.f32 %v2739_v4, %v956_v45  ;;  %738 = vadd.xlane.f32.xlu1 %v737_v46 }
 0x376   : > { %1855 = vmatmul.mubr.msk.bf16.vlgmr.msra.gmra.mrb[12].mxu0 %vm618_vm4, %v740_v47 }
 0x377   : > { %v958_v28 = vmul.f32 1.442695, %v957_v48  ;;  %1865 = vmatpush3.bf16.msra.mxu0 %v859_v49  ;;  %1866 = vmatprep.mubr.msk.bf16.mxu0 %vm2345_vm0, %v2344_v0 }
 0x378   : > { %1876 = vmatprep.subr.bf16.mxu0 %v2344_v0  ;;  %v1076_v56 = vpop.permute.xlu0 %1075 }
 0x379   : > { %2075 = vpow2.f32 %v958_v28  ;;  %v1081_v59 = vsel %vm632_vm3, %v1076_v56, 0 }
 0x37b   : > { %v2074_v50 = vpop.eup %2073 }
 0x37c   : > { %v849_v52 = vsel %vm618_vm4, %v2074_v50, 0.0  ;;  %v852_v53 = vpack.c.bf16 %v2074_v50, %v2074_v50 }
 0x37d   : > { %850 = vadd.xlane.f32.xlu0 %v849_v52 }
 0x37e   : > { %1867 = vmatmul.mubr.msk.bf16.vlgmr.msra.gmra.mrb[16].mxu0 %vm618_vm4, %v852_v53 }
 0x37f   : > { %1877 = vmatpush3.bf16.msra.mxu0 %v970_v54  ;;  %1878 = vmatprep.mubr.msk.bf16.mxu0 %vm2345_vm0, %v2344_v0 }
 0x380   : > { %1888 = vmatprep.subr.bf16.mxu0 %v2344_v0 }
 0x383   : > { %v2076_v55 = vpop.eup %2075 }
 0x384   : > { %v960_v57 = vsel %vm618_vm4, %v2076_v55, 0.0  ;;  %v963_v58 = vpack.c.bf16 %v2076_v55, %v2076_v55 }
 0x385   : > { %961 = vadd.xlane.f32.xlu0 %v960_v57 }
 0x386   : > { %1879 = vmatmul.mubr.msk.bf16.vlgmr.msra.gmra.mrb[20].mxu0 %vm618_vm4, %v963_v58 }
 0x387   : > { %1889 = vmatpush3.bf16.msra.mxu0 %v1081_v59  ;;  %1890 = vmatprep.mubr.msk.bf16.mxu0 %vm2345_vm0, %v2344_v0 }
 0x388   : > { %1900 = vmatprep.subr.bf16.mxu0 %v2344_v0 }
 0x399   : > { %v1067_v60 = vpop.xlane.xlu1 %1066 }
 0x39a   : > { %v1068_v61 = vsub.f32 %v2745_v10, %v1067_v60 }
 0x39c   : > { %v1069_v62 = vmul.f32 1.442695, %v1068_v61 }
 0x39d   : > { %v1178_v63 = vpop.xlane.xlu1 %1177 }
 0x39e   : > { %2077 = vpow2.f32 %v1069_v62  ;;  %v1179_v1 = vsub.f32 %v2747_v17, %v1178_v63 }
 0x3a0   : > { %v1180_v2 = vmul.f32 1.442695, %v1179_v1 }
 0x3a1   : > { %v1400_v3 = vpop.xlane.xlu1 %1399 }
 0x3a2   : > { %2079 = vpow2.f32 %v1180_v2  ;;  %v1401_v4 = vsub.f32 %v2759_v29, %v1400_v3 }
 0x3a4   : > { %v1402_v5 = vmul.f32 1.442695, %v1401_v4 }
 0x3a5   : > { %v1187_v7 = vpop.permute.xlu1 %1186 }
 0x3a6   : > { %2081 = vpow2.f32 %v1402_v5  ;;  %v1192_v12 = vsel %vm632_vm3, %v1187_v7, 0 }
 0x3a8   : > { %v2078_v6 = vpop.eup %2077 }
 0x3a9   : > { %v1289_v8 = vpop.xlane.xlu0 %1288  ;;  %v1071_v9 = vsel %vm618_vm4, %v2078_v6, 0.0  ;;  %v1074_v11 = vpack.c.bf16 %v2078_v6, %v2078_v6 }
 0x3aa   : > { %v1290_v10 = vsub.f32 %v2749_v21, %v1289_v8  ;;  %1072 = vadd.xlane.f32.xlu1 %v1071_v9 }
 0x3ab   : > { %1891 = vmatmul.mubr.msk.bf16.vlgmr.msra.gmra.mrb[24].mxu0 %vm618_vm4, %v1074_v11 }
 0x3ac   : > { %v2080_v13 = vpop.eup %2079  ;;  %v1291_v14 = vmul.f32 1.442695, %v1290_v10  ;;  %1901 = vmatpush3.bf16.msra.mxu0 %v1192_v12  ;;  %1902 = vmatprep.mubr.msk.bf16.mxu0 %vm2345_vm0, %v2344_v0 }
 0x3ad   : > { %v1182_v15 = vsel %vm618_vm4, %v2080_v13, 0.0  ;;  %1912 = vmatprep.subr.bf16.mxu0 %v2344_v0  ;;  %v1298_v17 = vpop.permute.xlu0 %1297  ;;  %v1185_v19 = vpack.c.bf16 %v2080_v13, %v2080_v13 }
 0x3ae   : > { %2083 = vpow2.f32 %v1291_v14  ;;  %1183 = vadd.xlane.f32.xlu0 %v1182_v15  ;;  %v1303_v20 = vsel %vm632_vm3, %v1298_v17, 0  ;;  %v2067_v15 = vld [vmem:[%s2898_s5] sm:$0xff]  }
 0x3af   : > { %1931 = vmatpush3.bf16.msra.mxu1 %v2067_v15 }
 0x3b0   : > { %v2082_v16 = vpop.eup %2081  ;;  %1932 = vmatprep.subr.bf16.mxu1 %v2344_v0 }
 0x3b1   : > { %v1404_v18 = vsel %vm618_vm4, %v2082_v16, 0.0  ;;  %v1409_v22 = vpop.permute.xlu0 %1408  ;;  %v1407_v29 = vpack.c.bf16 %v2082_v16, %v2082_v16 }
 0x3b2   : > { %1405 = vadd.xlane.f32.xlu0 %v1404_v18  ;;  %v1414_v26 = vsel %vm632_vm3, %v1409_v22, 0 }
 0x3b3   : > { %1903 = vmatmul.mubr.msk.bf16.vlgmr.msra.gmra.mrb[28].mxu0 %vm618_vm4, %v1185_v19  ;;  %v2068_v19 = vld [vmem:[%s2898_s5 + $0x8] sm:$0xff]  }
 0x3b4   : > { %1913 = vmatpush3.bf16.msra.mxu0 %v1303_v20  ;;  %1914 = vmatprep.mubr.msk.bf16.mxu0 %vm2345_vm0, %v2344_v0 }
 0x3b5   : > { %1924 = vmatprep.subr.bf16.mxu0 %v2344_v0  ;;  %1933 = vmatpush3.bf16.msra.mxu1 %v2068_v19 }
 0x3b8   : > { %v2084_v21 = vpop.eup %2083 }
 0x3b9   : > { %v1293_v23 = vsel %vm618_vm4, %v2084_v21, 0.0  ;;  %v1296_v24 = vpack.c.bf16 %v2084_v21, %v2084_v21 }
 0x3ba   : > { %1294 = vadd.xlane.f32.xlu1 %v1293_v23 }
 0x3bb   : > { %1915 = vmatmul.mubr.msk.bf16.vlgmr.msra.gmra.mrb[32].mxu0 %vm618_vm4, %v1296_v24 }
 0x3bc   : > { %1925 = vmatpush3.bf16.msra.mxu0 %v1414_v26  ;;  %1926 = vmatprep.mubr.msk.bf16.mxu0 %vm2345_vm0, %v2344_v0 }
 0x3be   : > { %626 = vadd.xlane.f32.xlu1 %v625_v27 }
 0x3c3   : > { %1927 = vmatmul.mubr.msk.bf16.vlgmr.msra.gmra.mrb[36].mxu0 %vm618_vm4, %v1407_v29 }
 0x3d7   : > { %v2822_v30 = vpop.f32.mrb[8].mxu0 }
 0x3d8   : > { %v1844_v31 = vpop.f32.mrb[9].mxu0 }
 0x3d9   : > { %v673_v32 = vpop.f32.mrb[10].mxu0 }
 0x3da   : > { %v1845_v33 = vpop.f32.mrb[11].mxu0 }
 0x402   : > { %v739_v34 = vpop.xlane.xlu1 %738 }
 0x403   : > { %2085 = vrcp.f32 %v739_v34 }
 0x40a   : > { %v851_v35 = vpop.xlane.xlu0 %850 }
 0x40b   : > { %2087 = vrcp.f32 %v851_v35 }
 0x40d   : > { %v2086_v36 = vpop.eup %2085 }
 0x412   : > { %v962_v41 = vpop.xlane.xlu0 %961 }
 0x413   : > { %2089 = vrcp.f32 %v962_v41 }
 0x415   : > { %v2088_v43 = vpop.eup %2087 }
 0x41d   : > { %v2090_v28 = vpop.eup %2089 }
 0x437   : > { %v1073_v56 = vpop.xlane.xlu1 %1072 }
 0x438   : > { %2091 = vrcp.f32 %v1073_v56 }
 0x43b   : > { %v1184_v57 = vpop.xlane.xlu0 %1183 }
 0x43c   : > { %2093 = vrcp.f32 %v1184_v57 }
 0x43f   : > { %v1406_v8 = vpop.xlane.xlu0 %1405 }
 0x442   : > { %v2092_v58 = vpop.eup %2091 }
 0x446   : > { %v2094_v3 = vpop.eup %2093 }
 0x447   : > { %v1295_v63 = vpop.xlane.xlu1 %1294 }
 0x448   : > { %2095 = vrcp.f32 %v1295_v63 }
 0x449   : > { %v784_v37 = vpop.f32.mrb[12].mxu0  ;;  %2097 = vrcp.f32 %v1406_v8 }
 0x44a   : > { %v791_v38 = vmul.f32 %v2086_v36, %v784_v37  ;;  %v1856_v39 = vpop.f32.mrb[13].mxu0 }
 0x44b   : > { %v787_v40 = vpop.f32.mrb[14].mxu0  ;;  %v627_v29 = vpop.xlane.xlu1 %626 }
 0x44c   : > { %v792_v25 = vpack.c.bf16 %v791_v38, %v791_v38  ;;  %v1857_v42 = vpop.f32.mrb[15].mxu0  ;;  %2099 = vrcp.f32 %v627_v29 }
 0x44e   : > { %1460 = vrot.lane.b32.xlu0 %v792_v25, %s2353_s16  ;;  %s1763_s16 = sshll.u32 %s2325_s27, 7  ;;  %s1576_s27 = scalar_lea.sflag [#allocation5], %s2636_s1 }
 0x44f   : > { %s2843_s14 = scalar_lea.hbm %s2923_s22, %s1763_s16 }
 0x451   : > { %v895_v44 = vpop.f32.mrb[16].mxu0 }
 0x452   : > { %v902_v45 = vmul.f32 %v2088_v43, %v895_v44  ;;  %v1868_v46 = vpop.f32.mrb[17].mxu0  ;;  %v2096_v10 = vpop.eup %2095 }
 0x453   : > { %v898_v47 = vpop.f32.mrb[18].mxu0  ;;  %v2098_v20 = vpop.eup %2097  ;;  %v1758_v46 = vld [vmem:[%s2899_s6] ss:$0 sm:$0xff] }
 0x454   : > { %v903_v48 = vpack.c.bf16 %v902_v45, %v902_v45  ;;  %v1869_v49 = vpop.f32.mrb[19].mxu0 }
 0x456   : > { %1463 = vrot.lane.b32.xlu1 %v903_v48, %s2354_s30  ;;  %v2100_v31 = vpop.eup %2099  ;;  %s363_s30 = scalar_lea.vmem [#allocation12], %s1729_s20 }
 0x457   : > { %v677_v33 = vmul.f32 %v2100_v31, %v2822_v30 }
 0x459   : > { %v1006_v50 = vpop.f32.mrb[20].mxu0  ;;  %v678_v35 = vpack.c.bf16 %v677_v33, %v677_v33 }
 0x45a   : > { %v1013_v51 = vmul.f32 %v2090_v28, %v1006_v50  ;;  %v1880_v52 = vpop.f32.mrb[21].mxu0 }
 0x45b   : > { %v1009_v53 = vpop.f32.mrb[22].mxu0 }
 0x45c   : > { %v1014_v54 = vpack.c.bf16 %v1013_v51, %v1013_v51  ;;  %v1881_v55 = vpop.f32.mrb[23].mxu0 }
 0x45e   : > { %1466 = vrot.lane.b32.xlu1 %v1014_v54, %s2355_s15  ;;  %s1589_s15 = sshll.u32 %s363_s30, 4  ;;  %s2845_s15 = int_to_ptr.vmem [resolvable:$true] %s1589_s15 }
 0x45f   : > { %s2243_s8 = scalar_lea.vmem %s2845_s15, 128 }
 0x460   : > { %p2244_p2 = scmp.ne.s32.totalorder %s2845_s15, %s2243_s8 }
 0x462   : > { %p2245_p10 = pnand %p2244_p2, %p2924_p9 }
 0x464   : > { %p2246_p1 = pneg %p2245_p10 }
 0x47e   : > { %v1117_v59 = vpop.f32.mrb[24].mxu0 }
 0x47f   : > { %v1124_v60 = vmul.f32 %v2092_v58, %v1117_v59  ;;  %v1892_v61 = vpop.f32.mrb[25].mxu0 }
 0x480   : > { %v1120_v62 = vpop.f32.mrb[26].mxu0 }
 0x481   : > { %v1125_v1 = vpack.c.bf16 %v1124_v60, %v1124_v60  ;;  %v1893_v2 = vpop.f32.mrb[27].mxu0 }
 0x483   : > { %1469 = vrot.lane.b32.xlu0 %v1125_v1, %s2356_s17 }
 0x486   : > { %v1228_v4 = vpop.f32.mrb[28].mxu0 }
 0x487   : > { %v1235_v5 = vmul.f32 %v2094_v3, %v1228_v4  ;;  %v1904_v6 = vpop.f32.mrb[29].mxu0 }
 0x488   : > { %v1231_v7 = vpop.f32.mrb[30].mxu0 }
 0x489   : > { %v1236_v9 = vpack.c.bf16 %v1235_v5, %v1235_v5  ;;  %v1905_v11 = vpop.f32.mrb[31].mxu0 }
 0x48b   : > { %1472 = vrot.lane.b32.xlu1 %v1236_v9, %s2357_s21 }
 0x48e   : > { %v1339_v12 = vpop.f32.mrb[32].mxu0 }
 0x48f   : > { %v1346_v13 = vmul.f32 %v2096_v10, %v1339_v12  ;;  %v1916_v14 = vpop.f32.mrb[33].mxu0 }
 0x490   : > { %v1342_v16 = vpop.f32.mrb[34].mxu0 }
 0x491   : > { %v1347_v17 = vpack.c.bf16 %v1346_v13, %v1346_v13  ;;  %v1917_v18 = vpop.f32.mrb[35].mxu0 }
 0x493   : > { %1475 = vrot.lane.b32.xlu0 %v1347_v17, %s2358_s23  ;;  %s2247_s23 = sshll.u32 %s2360_s9, 4  ;;  %s2248_s23 = int_to_ptr.vmem [resolvable:$false] %s2247_s23 }
 0x494   : > { %p2250_p0 = scmp.lt.s32.totalorder %s2845_s15, %s2248_s23 }
 0x496   : > { %v1450_v21 = vpop.f32.mrb[36].mxu0 }
 0x497   : > { %v1457_v22 = vmul.f32 %v2098_v20, %v1450_v21  ;;  %v1928_v23 = vpop.f32.mrb[37].mxu0 }
 0x498   : > { %v1453_v24 = vpop.f32.mrb[38].mxu0 }
 0x499   : > { %v1458_v26 = vpack.c.bf16 %v1457_v22, %v1457_v22  ;;  %v1929_v27 = vpop.f32.mrb[39].mxu0 }
 0x49b   : > { %1478 = vrot.lane.b32.xlu1 %v1458_v26, %s2359_s7  ;;  %s2249_s7 = scalar_lea.vmem %s2248_s23, 256 }
 0x49c   : > { %p2251_p7 = scmp.lt.s32.totalorder %s2249_s7, %s2243_s8 }
 0x49e   : > { %p2252_p5 = por %p2251_p7, %p2250_p0 }
 0x4a0   : > { %p2253_p8 = pnand %p2252_p5, %p2246_p1 }
 0x4c0   : > { %v1461_v34 = vpop.permute.xlu0 %1460 }
 0x4c1   : > { %v1482_v37 = vsel %vm571_vm2, %v678_v35, %v1461_v34 }
 0x4c8   : > { %v1464_v32 = vpop.permute.xlu1 %1463 }
 0x4c9   : > { %v1484_v38 = vsel %vm618_vm4, %v1482_v37, %v1464_v32 }
 0x4d0   : > { %v1467_v0 = vpop.permute.xlu1 %1466 }
 0x4d1   : > { %v1487_v40 = vsel %vm1485_vm5, %v1484_v38, %v1467_v0 }
 0x4f5   : > { %v1470_v36 = vpop.permute.xlu0 %1469 }
 0x4f6   : > { %v1490_v25 = vsel %vm1488_vm6, %v1487_v40, %v1470_v36 }
 0x4fd   : > { %v1473_v39 = vpop.permute.xlu1 %1472 }
 0x4fe   : > { %v1493_v30 = vsel %vm1491_vm7, %v1490_v25, %v1473_v39 }
 0x505   : > { %v1476_v41 = vpop.permute.xlu0 %1475 }
 0x506   : > { %v1496_v42 = vsel %vm1494_vm8, %v1493_v30, %v1476_v41 }
 0x50d   : > { %v1479_v43 = vpop.permute.xlu1 %1478 }
 0x50e   : > { %v1499_v44 = vsel %vm1497_vm9, %v1496_v42, %v1479_v43 }
 0x50f   : > { %1502 = vst.msk [vmem:[#allocation2] sm:$0xf] %vm1501_vm10, %v1499_v44 }
 0x516   : > { %v1507_v45 = vld [vmem:[#allocation2] sm:$0xf] }
 0x517   : > { %1935 = vmatmul.mubr.msk.bf16.vlgmr.msra.gmra.mrb[36].mxu1 %vm396_vm1, %v1507_v45 }
 0x5ea   : > { %v1568_v47 = vpop.f32.mrb[36].mxu1 }
 0x5eb   : > { %v1569_v48 = vadd.f32 %v1758_v46, %v1568_v47  ;;  %v1936_v49 = vpop.f32.mrb[37].mxu1 }
 0x5ec   : > { %v1571_v28 = vpop.f32.mrb[38].mxu1 }
 0x5ed   : > { %v1937_v50 = vpop.f32.mrb[39].mxu1  ;;  %1574 = vst.msk [vmem:[%s363_s30] sm:$0xff] %vm396_vm1, %v1569_v48 }
 0x5ee   : > { %2256 = shalt.err (!%p2253_p8)
}
 0x5ef   : > { %s2257_s1 = scalar_lea.hbm %s2843_s14, 128  ;;  %s2261_s18 = scalar_lea.hbm %s2923_s22, 256 }
 0x5f0   : > { %p2258_p3 = scmp.ne.s32.totalorder %s2843_s14, %s2257_s1  ;;  %p2262_p13 = scmp.lt.u32.totalorder %s2843_s14, %s2923_s22 }
 0x5f1   : > { %p2263_p12 = scmp.lt.u32.totalorder %s2261_s18, %s2257_s1  ;;  %p2265_p2 = scmp.lt.u32.totalorder %s2257_s1, %s2843_s14 }
 0x5f2   : > { %p2259_p11 = pnand %p2258_p3, %p2924_p9 }
 0x5f3   : > { %p2264_p4 = por %p2263_p12, %p2262_p13 }
 0x5f4   : > { %p2260_p6 = pneg %p2259_p11 }
 0x5f5   : > { %p2266_p10 = por %p2265_p2, %p2264_p4 }
 0x5f7   : > { %p2267_p1 = pnand %p2266_p10, %p2260_p6 }
 0x5f9   : > { %2270 = shalt.err (!%p2267_p1)
}
 0x5fa   : > { %1956 = dma.vmem_to_hbm [thread:$0]  (%p2924_p9), %s2845_s15, 128, %s2843_s14, %s1576_s27  }
 0x5fb PF: > { %s1601_s17 = sand.u32 1, %s2313_s24   ;;  %p2925_p0 = scmp.ne.s32.totalorder %s2919_s11, 0 }
 0x5fc   : > { %p2926_p7 = scmp.ge.s32.totalorder %s2333_s29, 2  ;;  %s1602_s21 = scalar_lea.sflag [#allocation5], %s1601_s17 }
 0x5fe   : > { %p1976_p5 = pnand %p2926_p7, %p2925_p0 }
 0x600   : > { %2308 = dma.done.wait (!%p1976_p5), %s1602_s21, 128  }
 0x601   : > { %2310 = vsyncadd (!%p1976_p5), %s1602_s21, 4294967168  ;;  %s25_s29 = sadd.s32 1, %s2333_s29   ;;  %s2927_s24 = smov %s2317_s25 }
 0x602   : > { %p22_p8 = scmp.ge.s32.totalorder %s25_s29, 4   ;;  %s2928_s25 = smov %s2321_s26 }
 0x603   : > { %s2929_s26 = smov %s2586_s13  ;;  %s2930_s27 = smov %s2329_s28 }
 0x604   : > { %s2931_s28 = smov %s2933_s19  ;;  %24 = sbr.rel (!%p22_p8) target bundleno = 11 (0xb), region = 117 }
 0x60b   :  { %1607 = vsyncpa [#allocation4], 1 }
 0x60c   :  { %1609 = vsyncpa [#allocation4 + $0x1], 1 }
 0x60d   :  { %1610 = vsyncpa [#allocation7], 1 }
 0x60e   :  { %1611 = vsyncpa [#allocation10], 1 }
 0x60f   :  { %1612 = vsyncpa [#allocation5], 1 }
 0x610   :  { %1614 = vsyncpa [#allocation5 + $0x1], 1 }

</bundles_post_ra>
